<compile_context>
chip_gen: v5e
topology: v5e:2x2
jax: 0.10.0
libtpu: 0.0.40
codegen_flags: <defaults>
</compile_context>

<pallas_src>
import jax
import jax.numpy as jnp
import numpy as np
from jax.experimental import pallas as pl
from jax.experimental.pallas import tpu as pltpu  # noqa: F401  (TPU backend import)


def _make_kernel(num_branches, batch, num_frames, stride, l_pads):
    """Fused kernel for `num_branches` ConvTranspose1d(out_channels=1) heads."""
    n = num_branches
    K = num_frames

    def kernel(*refs):
        x_refs = refs[0:n]           # (B*K, C)  bf16, channels on lanes
        w_refs = refs[n:2 * n]       # (C, L_pad_i)  bf16
        b_refs = refs[2 * n:3 * n]   # (1, 1)  f32
        o_refs = refs[3 * n:4 * n]   # (B, M_i, stride)  f32

        for i in range(n):           # static unroll over the 3 decoder branches
            l_pad = l_pads[i]
            P = l_pad // stride      # number of hops covered by one frame
            M = K + P - 1            # output length in hops

            x = x_refs[i][...]
            w = w_refs[i][...]
            bias = b_refs[i][...]

            # Synthesis matmul on the MXU: one length-L_pad frame per input step,
            # all batches at once (M dimension = B*K), f32 accumulation.
            frames = jnp.dot(x, w, preferred_element_type=jnp.float32)  # (B*K, L_pad)

            for b in range(batch):   # B is tiny; static unroll, tile-aligned slices
                f_b = frames[b * K:(b + 1) * K, :]                      # (K, L_pad)
                acc = None
                # Vectorized overlap-add: chunk p (shape (K, stride)) contributes to
                # output hops [p, p+K); shift it down by p hops and sum over p.
                for p in range(P):
                    chunk = f_b[:, p * stride:(p + 1) * stride]         # (K, stride)
                    pieces = []
                    if p > 0:
                        pieces.append(jnp.zeros((p, stride), jnp.float32))
                    pieces.append(chunk)
                    if P - 1 - p > 0:
                        pieces.append(jnp.zeros((P - 1 - p, stride), jnp.float32))
                    shifted = pieces[0] if len(pieces) == 1 else jnp.concatenate(pieces, axis=0)
                    acc = shifted if acc is None else acc + shifted     # (M, stride)
                o_refs[i][b] = acc + bias                               # single block store

    return kernel


def speech_decoder_forward(s_parts, weights, biases, stride):
    """s_parts: list of (B, C, K) f32; weights: list of (C, L_i); biases: list of scalars.

    Returns {'w1': (B,1,T_1), 'w2': (B,1,T_2), 'w3': (B,1,T_3)} with
    T_i = (K-1)*stride + L_i, matching PyTorch ConvTranspose1d(C, 1, L_i, stride).
    """
    n = len(weights)
    B, C, K = s_parts[0].shape

    xs, ws, bs, l_pads, t_outs = [], [], [], [], []
    for s, w in zip(s_parts, weights):
        L = w.shape[1]
        P = pl.cdiv(L, stride)
        l_pad = int(P) * stride
        if l_pad > L:  # pad kernel taps with zeros so L becomes a multiple of the hop
            w = jnp.pad(w, ((0, 0), (0, l_pad - L)))
        # Layout plumbing in the wrapper: channels -> lanes, batch folded into rows.
        xs.append(jnp.transpose(s, (0, 2, 1)).reshape(B * K, C).astype(jnp.bfloat16))
        ws.append(w.astype(jnp.bfloat16))          # MXU-native operand dtype
        l_pads.append(l_pad)
        t_outs.append((K - 1) * stride + L)
    bs = [jnp.asarray(b, jnp.float32).reshape(1, 1) for b in biases]

    out_shape = [jax.ShapeDtypeStruct((B, K + lp // stride - 1, stride), jnp.float32)
                 for lp in l_pads]
    kernel = _make_kernel(n, B, K, stride, tuple(l_pads))

    # Single invocation (no grid): whole problem fits comfortably in VMEM, so there
    # is no per-batch grid-step overhead and no pipelining/scratch machinery needed.
    outs = pl.pallas_call(kernel, out_shape=out_shape)(*xs, *ws, *bs)

    result = {}
    for i, o in enumerate(outs):
        flat = o.reshape(B, -1)[:, :t_outs[i]]     # drop the zero-padded tail (if any)
        result[f'w{i + 1}'] = flat[:, None, :]     # (B, 1, T_i), like the PyTorch module
    return result


def reference_forward(s_parts, weights, biases, stride):
    """Plain-JAX reference matching PyTorch ConvTranspose1d semantics."""
    out = {}
    for i, (s, w, b) in enumerate(zip(s_parts, weights, biases)):
        B, C, K = s.shape
        L = w.shape[1]
        T = (K - 1) * stride + L
        frames = jnp.einsum('bcj,cl->bjl', s, w)   # (B, K, L)
        y = jnp.zeros((B, T), jnp.float32)
        for j in range(K):
            y = y.at[:, j * stride:j * stride + L].add(frames[:, j, :])
        out[f'w{i + 1}'] = (y + b)[:, None, :]
    return out


if __name__ == "__main__":
    # Small shapes consistent with SpeechDecoder(L1=40, L2=160, L3=320, in_channels=256):
    # s_i: (B=2, 256, K=8)  ->  w_i: (2, 1, (K-1)*20 + L_i) = (2,1,180)/(2,1,300)/(2,1,460).
    B, C, K = 2, 256, 8
    L1, L2, L3 = 40, 160, 320
    stride = L1 // 2

    key = jax.random.PRNGKey(0)
    ks = jax.random.split(key, 9)

    def bf16_exact(a):
        # Keep values exactly representable in bf16 so the bf16 MXU path matches
        # the f32 reference bit-for-bit up to f32 accumulation order.
        return a.astype(jnp.bfloat16).astype(jnp.float32)

    s_parts = [bf16_exact(jax.random.normal(ks[i], (B, C, K), dtype=jnp.float32))
               for i in range(3)]
    weights = [bf16_exact(0.1 * jax.random.normal(ks[3 + i], (C, L), dtype=jnp.float32))
               for i, L in enumerate((L1, L2, L3))]
    biases = [bf16_exact(0.1 * jax.random.normal(ks[6 + i], (), dtype=jnp.float32))
              for i in range(3)]

    out = speech_decoder_forward(s_parts, weights, biases, stride)
    jax.block_until_ready(out)

    ref = reference_forward(s_parts, weights, biases, stride)
    for name in ('w1', 'w2', 'w3'):
        assert out[name].shape == ref[name].shape, (out[name].shape, ref[name].shape)
        np.testing.assert_allclose(np.asarray(out[name]), np.asarray(ref[name]),
                                   rtol=2e-3, atol=2e-3)
    print("KERNEL_OK")
</pallas_src>

<mosaic_0001>
module attributes {stable_mosaic.version = 11 : i64} {
  func.func @kernel(%arg0: memref<16x256xbf16, #tpu.memory_space<vmem>>, %arg1: memref<16x256xbf16, #tpu.memory_space<vmem>>, %arg2: memref<16x256xbf16, #tpu.memory_space<vmem>>, %arg3: memref<256x40xbf16, #tpu.memory_space<vmem>>, %arg4: memref<256x160xbf16, #tpu.memory_space<vmem>>, %arg5: memref<256x320xbf16, #tpu.memory_space<vmem>>, %arg6: memref<1x1xf32, #tpu.memory_space<vmem>>, %arg7: memref<1x1xf32, #tpu.memory_space<vmem>>, %arg8: memref<1x1xf32, #tpu.memory_space<vmem>>, %arg9: memref<2x9x20xf32, #tpu.memory_space<vmem>>, %arg10: memref<2x15x20xf32, #tpu.memory_space<vmem>>, %arg11: memref<2x23x20xf32, #tpu.memory_space<vmem>>) attributes {dimension_semantics = [], scalar_prefetch = 0 : i64, scratch_operands = 0 : i64, tpu.core_type = #tpu.core_type<tc>} {
    %c0 = arith.constant 0 : index
    %c0_0 = arith.constant 0 : index
    %0 = vector.load %arg0[%c0, %c0_0] : memref<16x256xbf16, #tpu.memory_space<vmem>>, vector<16x256xbf16>
    %c0_1 = arith.constant 0 : index
    %c0_2 = arith.constant 0 : index
    %1 = vector.load %arg3[%c0_1, %c0_2] : memref<256x40xbf16, #tpu.memory_space<vmem>>, vector<256x40xbf16>
    %c0_3 = arith.constant 0 : index
    %c0_4 = arith.constant 0 : index
    %2 = vector.load %arg6[%c0_3, %c0_4] : memref<1x1xf32, #tpu.memory_space<vmem>>, vector<1x1xf32>
    %cst = arith.constant dense<0.000000e+00> : vector<16x40xf32>
    %3 = tpu.matmul %0, %1, %cst {dimension_numbers = #tpu.dot_dimension_numbers<[1], [0], [0], [1], [0, 0, 1, 1], [], []>} : vector<16x256xbf16>, vector<256x40xbf16>, vector<16x40xf32> -> vector<16x40xf32>
    %4 = vector.extract_strided_slice %3 {offsets = [0, 0], sizes = [8, 40], strides = [1, 1]} : vector<16x40xf32> to vector<8x40xf32>
    %5 = vector.extract_strided_slice %4 {offsets = [0, 0], sizes = [8, 20], strides = [1, 1]} : vector<8x40xf32> to vector<8x20xf32>
    %cst_5 = arith.constant 0.000000e+00 : f32
    %6 = vector.broadcast %cst_5 : f32 to vector<1x20xf32>
    %7 = tpu.concatenate %5, %6 in 0 : vector<8x20xf32>, vector<1x20xf32> -> vector<9x20xf32>
    %8 = vector.extract_strided_slice %4 {offsets = [0, 20], sizes = [8, 20], strides = [1, 1]} : vector<8x40xf32> to vector<8x20xf32>
    %cst_6 = arith.constant 0.000000e+00 : f32
    %9 = vector.broadcast %cst_6 : f32 to vector<1x20xf32>
    %10 = tpu.concatenate %9, %8 in 0 : vector<1x20xf32>, vector<8x20xf32> -> vector<9x20xf32>
    %11 = arith.addf %7, %10 : vector<9x20xf32>
    %12 = vector.broadcast %2 : vector<1x1xf32> to vector<9x20xf32>
    %13 = arith.addf %11, %12 : vector<9x20xf32>
    %c0_7 = arith.constant 0 : index
    %c0_8 = arith.constant 0 : index
    %c0_9 = arith.constant 0 : index
    %14 = vector.load %arg9[%c0_7, %c0_8, %c0_9] : memref<2x9x20xf32, #tpu.memory_space<vmem>>, vector<1x9x20xf32>
    %15 = vector.shape_cast %14 : vector<1x9x20xf32> to vector<9x20xf32>
    %16 = vector.shape_cast %13 : vector<9x20xf32> to vector<1x9x20xf32>
    tpu.vector_store %arg9[%c0_7, %c0_8, %c0_9], %16 {strides = array<i32>} : memref<2x9x20xf32, #tpu.memory_space<vmem>>, vector<1x9x20xf32>,
    %17 = vector.extract_strided_slice %3 {offsets = [8, 0], sizes = [8, 40], strides = [1, 1]} : vector<16x40xf32> to vector<8x40xf32>
    %18 = vector.extract_strided_slice %17 {offsets = [0, 0], sizes = [8, 20], strides = [1, 1]} : vector<8x40xf32> to vector<8x20xf32>
    %cst_10 = arith.constant 0.000000e+00 : f32
    %19 = vector.broadcast %cst_10 : f32 to vector<1x20xf32>
    %20 = tpu.concatenate %18, %19 in 0 : vector<8x20xf32>, vector<1x20xf32> -> vector<9x20xf32>
    %21 = vector.extract_strided_slice %17 {offsets = [0, 20], sizes = [8, 20], strides = [1, 1]} : vector<8x40xf32> to vector<8x20xf32>
    %cst_11 = arith.constant 0.000000e+00 : f32
    %22 = vector.broadcast %cst_11 : f32 to vector<1x20xf32>
    %23 = tpu.concatenate %22, %21 in 0 : vector<1x20xf32>, vector<8x20xf32> -> vector<9x20xf32>
    %24 = arith.addf %20, %23 : vector<9x20xf32>
    %25 = vector.broadcast %2 : vector<1x1xf32> to vector<9x20xf32>
    %26 = arith.addf %24, %25 : vector<9x20xf32>
    %c1 = arith.constant 1 : index
    %c0_12 = arith.constant 0 : index
    %c0_13 = arith.constant 0 : index
    %27 = vector.load %arg9[%c1, %c0_12, %c0_13] : memref<2x9x20xf32, #tpu.memory_space<vmem>>, vector<1x9x20xf32>
    %28 = vector.shape_cast %27 : vector<1x9x20xf32> to vector<9x20xf32>
    %29 = vector.shape_cast %26 : vector<9x20xf32> to vector<1x9x20xf32>
    tpu.vector_store %arg9[%c1, %c0_12, %c0_13], %29 {strides = array<i32>} : memref<2x9x20xf32, #tpu.memory_space<vmem>>, vector<1x9x20xf32>,
    %c0_14 = arith.constant 0 : index
    %c0_15 = arith.constant 0 : index
    %30 = vector.load %arg1[%c0_14, %c0_15] : memref<16x256xbf16, #tpu.memory_space<vmem>>, vector<16x256xbf16>
    %c0_16 = arith.constant 0 : index
    %c0_17 = arith.constant 0 : index
    %31 = vector.load %arg4[%c0_16, %c0_17] : memref<256x160xbf16, #tpu.memory_space<vmem>>, vector<256x160xbf16>
    %c0_18 = arith.constant 0 : index
    %c0_19 = arith.constant 0 : index
    %32 = vector.load %arg7[%c0_18, %c0_19] : memref<1x1xf32, #tpu.memory_space<vmem>>, vector<1x1xf32>
    %cst_20 = arith.constant dense<0.000000e+00> : vector<16x160xf32>
    %33 = tpu.matmul %30, %31, %cst_20 {dimension_numbers = #tpu.dot_dimension_numbers<[1], [0], [0], [1], [0, 0, 1, 1], [], []>} : vector<16x256xbf16>, vector<256x160xbf16>, vector<16x160xf32> -> vector<16x160xf32>
    %34 = vector.extract_strided_slice %33 {offsets = [0, 0], sizes = [8, 160], strides = [1, 1]} : vector<16x160xf32> to vector<8x160xf32>
    %35 = vector.extract_strided_slice %34 {offsets = [0, 0], sizes = [8, 20], strides = [1, 1]} : vector<8x160xf32> to vector<8x20xf32>
    %cst_21 = arith.constant 0.000000e+00 : f32
    %36 = vector.broadcast %cst_21 : f32 to vector<7x20xf32>
    %37 = tpu.concatenate %35, %36 in 0 : vector<8x20xf32>, vector<7x20xf32> -> vector<15x20xf32>
    %38 = vector.extract_strided_slice %34 {offsets = [0, 20], sizes = [8, 20], strides = [1, 1]} : vector<8x160xf32> to vector<8x20xf32>
    %cst_22 = arith.constant 0.000000e+00 : f32
    %39 = vector.broadcast %cst_22 : f32 to vector<1x20xf32>
    %cst_23 = arith.constant 0.000000e+00 : f32
    %40 = vector.broadcast %cst_23 : f32 to vector<6x20xf32>
    %41 = tpu.concatenate %39, %38, %40 in 0 : vector<1x20xf32>, vector<8x20xf32>, vector<6x20xf32> -> vector<15x20xf32>
    %42 = arith.addf %37, %41 : vector<15x20xf32>
    %43 = vector.extract_strided_slice %34 {offsets = [0, 40], sizes = [8, 20], strides = [1, 1]} : vector<8x160xf32> to vector<8x20xf32>
    %cst_24 = arith.constant 0.000000e+00 : f32
    %44 = vector.broadcast %cst_24 : f32 to vector<2x20xf32>
    %cst_25 = arith.constant 0.000000e+00 : f32
    %45 = vector.broadcast %cst_25 : f32 to vector<5x20xf32>
    %46 = tpu.concatenate %44, %43, %45 in 0 : vector<2x20xf32>, vector<8x20xf32>, vector<5x20xf32> -> vector<15x20xf32>
    %47 = arith.addf %42, %46 : vector<15x20xf32>
    %48 = vector.extract_strided_slice %34 {offsets = [0, 60], sizes = [8, 20], strides = [1, 1]} : vector<8x160xf32> to vector<8x20xf32>
    %cst_26 = arith.constant 0.000000e+00 : f32
    %49 = vector.broadcast %cst_26 : f32 to vector<3x20xf32>
    %cst_27 = arith.constant 0.000000e+00 : f32
    %50 = vector.broadcast %cst_27 : f32 to vector<4x20xf32>
    %51 = tpu.concatenate %49, %48, %50 in 0 : vector<3x20xf32>, vector<8x20xf32>, vector<4x20xf32> -> vector<15x20xf32>
    %52 = arith.addf %47, %51 : vector<15x20xf32>
    %53 = vector.extract_strided_slice %34 {offsets = [0, 80], sizes = [8, 20], strides = [1, 1]} : vector<8x160xf32> to vector<8x20xf32>
    %cst_28 = arith.constant 0.000000e+00 : f32
    %54 = vector.broadcast %cst_28 : f32 to vector<4x20xf32>
    %cst_29 = arith.constant 0.000000e+00 : f32
    %55 = vector.broadcast %cst_29 : f32 to vector<3x20xf32>
    %56 = tpu.concatenate %54, %53, %55 in 0 : vector<4x20xf32>, vector<8x20xf32>, vector<3x20xf32> -> vector<15x20xf32>
    %57 = arith.addf %52, %56 : vector<15x20xf32>
    %58 = vector.extract_strided_slice %34 {offsets = [0, 100], sizes = [8, 20], strides = [1, 1]} : vector<8x160xf32> to vector<8x20xf32>
    %cst_30 = arith.constant 0.000000e+00 : f32
    %59 = vector.broadcast %cst_30 : f32 to vector<5x20xf32>
    %cst_31 = arith.constant 0.000000e+00 : f32
    %60 = vector.broadcast %cst_31 : f32 to vector<2x20xf32>
    %61 = tpu.concatenate %59, %58, %60 in 0 : vector<5x20xf32>, vector<8x20xf32>, vector<2x20xf32> -> vector<15x20xf32>
    %62 = arith.addf %57, %61 : vector<15x20xf32>
    %63 = vector.extract_strided_slice %34 {offsets = [0, 120], sizes = [8, 20], strides = [1, 1]} : vector<8x160xf32> to vector<8x20xf32>
    %cst_32 = arith.constant 0.000000e+00 : f32
    %64 = vector.broadcast %cst_32 : f32 to vector<6x20xf32>
    %cst_33 = arith.constant 0.000000e+00 : f32
    %65 = vector.broadcast %cst_33 : f32 to vector<1x20xf32>
    %66 = tpu.concatenate %64, %63, %65 in 0 : vector<6x20xf32>, vector<8x20xf32>, vector<1x20xf32> -> vector<15x20xf32>
    %67 = arith.addf %62, %66 : vector<15x20xf32>
    %68 = vector.extract_strided_slice %34 {offsets = [0, 140], sizes = [8, 20], strides = [1, 1]} : vector<8x160xf32> to vector<8x20xf32>
    %cst_34 = arith.constant 0.000000e+00 : f32
    %69 = vector.broadcast %cst_34 : f32 to vector<7x20xf32>
    %70 = tpu.concatenate %69, %68 in 0 : vector<7x20xf32>, vector<8x20xf32> -> vector<15x20xf32>
    %71 = arith.addf %67, %70 : vector<15x20xf32>
    %72 = vector.broadcast %32 : vector<1x1xf32> to vector<15x20xf32>
    %73 = arith.addf %71, %72 : vector<15x20xf32>
    %c0_35 = arith.constant 0 : index
    %c0_36 = arith.constant 0 : index
    %c0_37 = arith.constant 0 : index
    %74 = vector.load %arg10[%c0_35, %c0_36, %c0_37] : memref<2x15x20xf32, #tpu.memory_space<vmem>>, vector<1x15x20xf32>
    %75 = vector.shape_cast %74 : vector<1x15x20xf32> to vector<15x20xf32>
    %76 = vector.shape_cast %73 : vector<15x20xf32> to vector<1x15x20xf32>
    tpu.vector_store %arg10[%c0_35, %c0_36, %c0_37], %76 {strides = array<i32>} : memref<2x15x20xf32, #tpu.memory_space<vmem>>, vector<1x15x20xf32>,
    %77 = vector.extract_strided_slice %33 {offsets = [8, 0], sizes = [8, 160], strides = [1, 1]} : vector<16x160xf32> to vector<8x160xf32>
    %78 = vector.extract_strided_slice %77 {offsets = [0, 0], sizes = [8, 20], strides = [1, 1]} : vector<8x160xf32> to vector<8x20xf32>
    %cst_38 = arith.constant 0.000000e+00 : f32
    %79 = vector.broadcast %cst_38 : f32 to vector<7x20xf32>
    %80 = tpu.concatenate %78, %79 in 0 : vector<8x20xf32>, vector<7x20xf32> -> vector<15x20xf32>
    %81 = vector.extract_strided_slice %77 {offsets = [0, 20], sizes = [8, 20], strides = [1, 1]} : vector<8x160xf32> to vector<8x20xf32>
    %cst_39 = arith.constant 0.000000e+00 : f32
    %82 = vector.broadcast %cst_39 : f32 to vector<1x20xf32>
    %cst_40 = arith.constant 0.000000e+00 : f32
    %83 = vector.broadcast %cst_40 : f32 to vector<6x20xf32>
    %84 = tpu.concatenate %82, %81, %83 in 0 : vector<1x20xf32>, vector<8x20xf32>, vector<6x20xf32> -> vector<15x20xf32>
    %85 = arith.addf %80, %84 : vector<15x20xf32>
    %86 = vector.extract_strided_slice %77 {offsets = [0, 40], sizes = [8, 20], strides = [1, 1]} : vector<8x160xf32> to vector<8x20xf32>
    %cst_41 = arith.constant 0.000000e+00 : f32
    %87 = vector.broadcast %cst_41 : f32 to vector<2x20xf32>
    %cst_42 = arith.constant 0.000000e+00 : f32
    %88 = vector.broadcast %cst_42 : f32 to vector<5x20xf32>
    %89 = tpu.concatenate %87, %86, %88 in 0 : vector<2x20xf32>, vector<8x20xf32>, vector<5x20xf32> -> vector<15x20xf32>
    %90 = arith.addf %85, %89 : vector<15x20xf32>
    %91 = vector.extract_strided_slice %77 {offsets = [0, 60], sizes = [8, 20], strides = [1, 1]} : vector<8x160xf32> to vector<8x20xf32>
    %cst_43 = arith.constant 0.000000e+00 : f32
    %92 = vector.broadcast %cst_43 : f32 to vector<3x20xf32>
    %cst_44 = arith.constant 0.000000e+00 : f32
    %93 = vector.broadcast %cst_44 : f32 to vector<4x20xf32>
    %94 = tpu.concatenate %92, %91, %93 in 0 : vector<3x20xf32>, vector<8x20xf32>, vector<4x20xf32> -> vector<15x20xf32>
    %95 = arith.addf %90, %94 : vector<15x20xf32>
    %96 = vector.extract_strided_slice %77 {offsets = [0, 80], sizes = [8, 20], strides = [1, 1]} : vector<8x160xf32> to vector<8x20xf32>
    %cst_45 = arith.constant 0.000000e+00 : f32
    %97 = vector.broadcast %cst_45 : f32 to vector<4x20xf32>
    %cst_46 = arith.constant 0.000000e+00 : f32
    %98 = vector.broadcast %cst_46 : f32 to vector<3x20xf32>
    %99 = tpu.concatenate %97, %96, %98 in 0 : vector<4x20xf32>, vector<8x20xf32>, vector<3x20xf32> -> vector<15x20xf32>
    %100 = arith.addf %95, %99 : vector<15x20xf32>
    %101 = vector.extract_strided_slice %77 {offsets = [0, 100], sizes = [8, 20], strides = [1, 1]} : vector<8x160xf32> to vector<8x20xf32>
    %cst_47 = arith.constant 0.000000e+00 : f32
    %102 = vector.broadcast %cst_47 : f32 to vector<5x20xf32>
    %cst_48 = arith.constant 0.000000e+00 : f32
    %103 = vector.broadcast %cst_48 : f32 to vector<2x20xf32>
    %104 = tpu.concatenate %102, %101, %103 in 0 : vector<5x20xf32>, vector<8x20xf32>, vector<2x20xf32> -> vector<15x20xf32>
    %105 = arith.addf %100, %104 : vector<15x20xf32>
    %106 = vector.extract_strided_slice %77 {offsets = [0, 120], sizes = [8, 20], strides = [1, 1]} : vector<8x160xf32> to vector<8x20xf32>
    %cst_49 = arith.constant 0.000000e+00 : f32
    %107 = vector.broadcast %cst_49 : f32 to vector<6x20xf32>
    %cst_50 = arith.constant 0.000000e+00 : f32
    %108 = vector.broadcast %cst_50 : f32 to vector<1x20xf32>
    %109 = tpu.concatenate %107, %106, %108 in 0 : vector<6x20xf32>, vector<8x20xf32>, vector<1x20xf32> -> vector<15x20xf32>
    %110 = arith.addf %105, %109 : vector<15x20xf32>
    %111 = vector.extract_strided_slice %77 {offsets = [0, 140], sizes = [8, 20], strides = [1, 1]} : vector<8x160xf32> to vector<8x20xf32>
    %cst_51 = arith.constant 0.000000e+00 : f32
    %112 = vector.broadcast %cst_51 : f32 to vector<7x20xf32>
    %113 = tpu.concatenate %112, %111 in 0 : vector<7x20xf32>, vector<8x20xf32> -> vector<15x20xf32>
    %114 = arith.addf %110, %113 : vector<15x20xf32>
    %115 = vector.broadcast %32 : vector<1x1xf32> to vector<15x20xf32>
    %116 = arith.addf %114, %115 : vector<15x20xf32>
    %c1_52 = arith.constant 1 : index
    %c0_53 = arith.constant 0 : index
    %c0_54 = arith.constant 0 : index
    %117 = vector.load %arg10[%c1_52, %c0_53, %c0_54] : memref<2x15x20xf32, #tpu.memory_space<vmem>>, vector<1x15x20xf32>
    %118 = vector.shape_cast %117 : vector<1x15x20xf32> to vector<15x20xf32>
    %119 = vector.shape_cast %116 : vector<15x20xf32> to vector<1x15x20xf32>
    tpu.vector_store %arg10[%c1_52, %c0_53, %c0_54], %119 {strides = array<i32>} : memref<2x15x20xf32, #tpu.memory_space<vmem>>, vector<1x15x20xf32>,
    %c0_55 = arith.constant 0 : index
    %c0_56 = arith.constant 0 : index
    %120 = vector.load %arg2[%c0_55, %c0_56] : memref<16x256xbf16, #tpu.memory_space<vmem>>, vector<16x256xbf16>
    %c0_57 = arith.constant 0 : index
    %c0_58 = arith.constant 0 : index
    %121 = vector.load %arg5[%c0_57, %c0_58] : memref<256x320xbf16, #tpu.memory_space<vmem>>, vector<256x320xbf16>
    %c0_59 = arith.constant 0 : index
    %c0_60 = arith.constant 0 : index
    %122 = vector.load %arg8[%c0_59, %c0_60] : memref<1x1xf32, #tpu.memory_space<vmem>>, vector<1x1xf32>
    %cst_61 = arith.constant dense<0.000000e+00> : vector<16x320xf32>
    %123 = tpu.matmul %120, %121, %cst_61 {dimension_numbers = #tpu.dot_dimension_numbers<[1], [0], [0], [1], [0, 0, 1, 1], [], []>} : vector<16x256xbf16>, vector<256x320xbf16>, vector<16x320xf32> -> vector<16x320xf32>
    %124 = vector.extract_strided_slice %123 {offsets = [0, 0], sizes = [8, 320], strides = [1, 1]} : vector<16x320xf32> to vector<8x320xf32>
    %125 = vector.extract_strided_slice %124 {offsets = [0, 0], sizes = [8, 20], strides = [1, 1]} : vector<8x320xf32> to vector<8x20xf32>
    %cst_62 = arith.constant 0.000000e+00 : f32
    %126 = vector.broadcast %cst_62 : f32 to vector<15x20xf32>
    %127 = tpu.concatenate %125, %126 in 0 : vector<8x20xf32>, vector<15x20xf32> -> vector<23x20xf32>
    %128 = vector.extract_strided_slice %124 {offsets = [0, 20], sizes = [8, 20], strides = [1, 1]} : vector<8x320xf32> to vector<8x20xf32>
    %cst_63 = arith.constant 0.000000e+00 : f32
    %129 = vector.broadcast %cst_63 : f32 to vector<1x20xf32>
    %cst_64 = arith.constant 0.000000e+00 : f32
    %130 = vector.broadcast %cst_64 : f32 to vector<14x20xf32>
    %131 = tpu.concatenate %129, %128, %130 in 0 : vector<1x20xf32>, vector<8x20xf32>, vector<14x20xf32> -> vector<23x20xf32>
    %132 = arith.addf %127, %131 : vector<23x20xf32>
    %133 = vector.extract_strided_slice %124 {offsets = [0, 40], sizes = [8, 20], strides = [1, 1]} : vector<8x320xf32> to vector<8x20xf32>
    %cst_65 = arith.constant 0.000000e+00 : f32
    %134 = vector.broadcast %cst_65 : f32 to vector<2x20xf32>
    %cst_66 = arith.constant 0.000000e+00 : f32
    %135 = vector.broadcast %cst_66 : f32 to vector<13x20xf32>
    %136 = tpu.concatenate %134, %133, %135 in 0 : vector<2x20xf32>, vector<8x20xf32>, vector<13x20xf32> -> vector<23x20xf32>
    %137 = arith.addf %132, %136 : vector<23x20xf32>
    %138 = vector.extract_strided_slice %124 {offsets = [0, 60], sizes = [8, 20], strides = [1, 1]} : vector<8x320xf32> to vector<8x20xf32>
    %cst_67 = arith.constant 0.000000e+00 : f32
    %139 = vector.broadcast %cst_67 : f32 to vector<3x20xf32>
    %cst_68 = arith.constant 0.000000e+00 : f32
    %140 = vector.broadcast %cst_68 : f32 to vector<12x20xf32>
    %141 = tpu.concatenate %139, %138, %140 in 0 : vector<3x20xf32>, vector<8x20xf32>, vector<12x20xf32> -> vector<23x20xf32>
    %142 = arith.addf %137, %141 : vector<23x20xf32>
    %143 = vector.extract_strided_slice %124 {offsets = [0, 80], sizes = [8, 20], strides = [1, 1]} : vector<8x320xf32> to vector<8x20xf32>
    %cst_69 = arith.constant 0.000000e+00 : f32
    %144 = vector.broadcast %cst_69 : f32 to vector<4x20xf32>
    %cst_70 = arith.constant 0.000000e+00 : f32
    %145 = vector.broadcast %cst_70 : f32 to vector<11x20xf32>
    %146 = tpu.concatenate %144, %143, %145 in 0 : vector<4x20xf32>, vector<8x20xf32>, vector<11x20xf32> -> vector<23x20xf32>
    %147 = arith.addf %142, %146 : vector<23x20xf32>
    %148 = vector.extract_strided_slice %124 {offsets = [0, 100], sizes = [8, 20], strides = [1, 1]} : vector<8x320xf32> to vector<8x20xf32>
    %cst_71 = arith.constant 0.000000e+00 : f32
    %149 = vector.broadcast %cst_71 : f32 to vector<5x20xf32>
    %cst_72 = arith.constant 0.000000e+00 : f32
    %150 = vector.broadcast %cst_72 : f32 to vector<10x20xf32>
    %151 = tpu.concatenate %149, %148, %150 in 0 : vector<5x20xf32>, vector<8x20xf32>, vector<10x20xf32> -> vector<23x20xf32>
    %152 = arith.addf %147, %151 : vector<23x20xf32>
    %153 = vector.extract_strided_slice %124 {offsets = [0, 120], sizes = [8, 20], strides = [1, 1]} : vector<8x320xf32> to vector<8x20xf32>
    %cst_73 = arith.constant 0.000000e+00 : f32
    %154 = vector.broadcast %cst_73 : f32 to vector<6x20xf32>
    %cst_74 = arith.constant 0.000000e+00 : f32
    %155 = vector.broadcast %cst_74 : f32 to vector<9x20xf32>
    %156 = tpu.concatenate %154, %153, %155 in 0 : vector<6x20xf32>, vector<8x20xf32>, vector<9x20xf32> -> vector<23x20xf32>
    %157 = arith.addf %152, %156 : vector<23x20xf32>
    %158 = vector.extract_strided_slice %124 {offsets = [0, 140], sizes = [8, 20], strides = [1, 1]} : vector<8x320xf32> to vector<8x20xf32>
    %cst_75 = arith.constant 0.000000e+00 : f32
    %159 = vector.broadcast %cst_75 : f32 to vector<7x20xf32>
    %cst_76 = arith.constant 0.000000e+00 : f32
    %160 = vector.broadcast %cst_76 : f32 to vector<8x20xf32>
    %161 = tpu.concatenate %159, %158, %160 in 0 : vector<7x20xf32>, vector<8x20xf32>, vector<8x20xf32> -> vector<23x20xf32>
    %162 = arith.addf %157, %161 : vector<23x20xf32>
    %163 = vector.extract_strided_slice %124 {offsets = [0, 160], sizes = [8, 20], strides = [1, 1]} : vector<8x320xf32> to vector<8x20xf32>
    %cst_77 = arith.constant 0.000000e+00 : f32
    %164 = vector.broadcast %cst_77 : f32 to vector<8x20xf32>
    %cst_78 = arith.constant 0.000000e+00 : f32
    %165 = vector.broadcast %cst_78 : f32 to vector<7x20xf32>
    %166 = tpu.concatenate %164, %163, %165 in 0 : vector<8x20xf32>, vector<8x20xf32>, vector<7x20xf32> -> vector<23x20xf32>
    %167 = arith.addf %162, %166 : vector<23x20xf32>
    %168 = vector.extract_strided_slice %124 {offsets = [0, 180], sizes = [8, 20], strides = [1, 1]} : vector<8x320xf32> to vector<8x20xf32>
    %cst_79 = arith.constant 0.000000e+00 : f32
    %169 = vector.broadcast %cst_79 : f32 to vector<9x20xf32>
    %cst_80 = arith.constant 0.000000e+00 : f32
    %170 = vector.broadcast %cst_80 : f32 to vector<6x20xf32>
    %171 = tpu.concatenate %169, %168, %170 in 0 : vector<9x20xf32>, vector<8x20xf32>, vector<6x20xf32> -> vector<23x20xf32>
    %172 = arith.addf %167, %171 : vector<23x20xf32>
    %173 = vector.extract_strided_slice %124 {offsets = [0, 200], sizes = [8, 20], strides = [1, 1]} : vector<8x320xf32> to vector<8x20xf32>
    %cst_81 = arith.constant 0.000000e+00 : f32
    %174 = vector.broadcast %cst_81 : f32 to vector<10x20xf32>
    %cst_82 = arith.constant 0.000000e+00 : f32
    %175 = vector.broadcast %cst_82 : f32 to vector<5x20xf32>
    %176 = tpu.concatenate %174, %173, %175 in 0 : vector<10x20xf32>, vector<8x20xf32>, vector<5x20xf32> -> vector<23x20xf32>
    %177 = arith.addf %172, %176 : vector<23x20xf32>
    %178 = vector.extract_strided_slice %124 {offsets = [0, 220], sizes = [8, 20], strides = [1, 1]} : vector<8x320xf32> to vector<8x20xf32>
    %cst_83 = arith.constant 0.000000e+00 : f32
    %179 = vector.broadcast %cst_83 : f32 to vector<11x20xf32>
    %cst_84 = arith.constant 0.000000e+00 : f32
    %180 = vector.broadcast %cst_84 : f32 to vector<4x20xf32>
    %181 = tpu.concatenate %179, %178, %180 in 0 : vector<11x20xf32>, vector<8x20xf32>, vector<4x20xf32> -> vector<23x20xf32>
    %182 = arith.addf %177, %181 : vector<23x20xf32>
    %183 = vector.extract_strided_slice %124 {offsets = [0, 240], sizes = [8, 20], strides = [1, 1]} : vector<8x320xf32> to vector<8x20xf32>
    %cst_85 = arith.constant 0.000000e+00 : f32
    %184 = vector.broadcast %cst_85 : f32 to vector<12x20xf32>
    %cst_86 = arith.constant 0.000000e+00 : f32
    %185 = vector.broadcast %cst_86 : f32 to vector<3x20xf32>
    %186 = tpu.concatenate %184, %183, %185 in 0 : vector<12x20xf32>, vector<8x20xf32>, vector<3x20xf32> -> vector<23x20xf32>
    %187 = arith.addf %182, %186 : vector<23x20xf32>
    %188 = vector.extract_strided_slice %124 {offsets = [0, 260], sizes = [8, 20], strides = [1, 1]} : vector<8x320xf32> to vector<8x20xf32>
    %cst_87 = arith.constant 0.000000e+00 : f32
    %189 = vector.broadcast %cst_87 : f32 to vector<13x20xf32>
    %cst_88 = arith.constant 0.000000e+00 : f32
    %190 = vector.broadcast %cst_88 : f32 to vector<2x20xf32>
    %191 = tpu.concatenate %189, %188, %190 in 0 : vector<13x20xf32>, vector<8x20xf32>, vector<2x20xf32> -> vector<23x20xf32>
    %192 = arith.addf %187, %191 : vector<23x20xf32>
    %193 = vector.extract_strided_slice %124 {offsets = [0, 280], sizes = [8, 20], strides = [1, 1]} : vector<8x320xf32> to vector<8x20xf32>
    %cst_89 = arith.constant 0.000000e+00 : f32
    %194 = vector.broadcast %cst_89 : f32 to vector<14x20xf32>
    %cst_90 = arith.constant 0.000000e+00 : f32
    %195 = vector.broadcast %cst_90 : f32 to vector<1x20xf32>
    %196 = tpu.concatenate %194, %193, %195 in 0 : vector<14x20xf32>, vector<8x20xf32>, vector<1x20xf32> -> vector<23x20xf32>
    %197 = arith.addf %192, %196 : vector<23x20xf32>
    %198 = vector.extract_strided_slice %124 {offsets = [0, 300], sizes = [8, 20], strides = [1, 1]} : vector<8x320xf32> to vector<8x20xf32>
    %cst_91 = arith.constant 0.000000e+00 : f32
    %199 = vector.broadcast %cst_91 : f32 to vector<15x20xf32>
    %200 = tpu.concatenate %199, %198 in 0 : vector<15x20xf32>, vector<8x20xf32> -> vector<23x20xf32>
    %201 = arith.addf %197, %200 : vector<23x20xf32>
    %202 = vector.broadcast %122 : vector<1x1xf32> to vector<23x20xf32>
    %203 = arith.addf %201, %202 : vector<23x20xf32>
    %c0_92 = arith.constant 0 : index
    %c0_93 = arith.constant 0 : index
    %c0_94 = arith.constant 0 : index
    %204 = vector.load %arg11[%c0_92, %c0_93, %c0_94] : memref<2x23x20xf32, #tpu.memory_space<vmem>>, vector<1x23x20xf32>
    %205 = vector.shape_cast %204 : vector<1x23x20xf32> to vector<23x20xf32>
    %206 = vector.shape_cast %203 : vector<23x20xf32> to vector<1x23x20xf32>
    tpu.vector_store %arg11[%c0_92, %c0_93, %c0_94], %206 {strides = array<i32>} : memref<2x23x20xf32, #tpu.memory_space<vmem>>, vector<1x23x20xf32>,
    %207 = vector.extract_strided_slice %123 {offsets = [8, 0], sizes = [8, 320], strides = [1, 1]} : vector<16x320xf32> to vector<8x320xf32>
    %208 = vector.extract_strided_slice %207 {offsets = [0, 0], sizes = [8, 20], strides = [1, 1]} : vector<8x320xf32> to vector<8x20xf32>
    %cst_95 = arith.constant 0.000000e+00 : f32
    %209 = vector.broadcast %cst_95 : f32 to vector<15x20xf32>
    %210 = tpu.concatenate %208, %209 in 0 : vector<8x20xf32>, vector<15x20xf32> -> vector<23x20xf32>
    %211 = vector.extract_strided_slice %207 {offsets = [0, 20], sizes = [8, 20], strides = [1, 1]} : vector<8x320xf32> to vector<8x20xf32>
    %cst_96 = arith.constant 0.000000e+00 : f32
    %212 = vector.broadcast %cst_96 : f32 to vector<1x20xf32>
    %cst_97 = arith.constant 0.000000e+00 : f32
    %213 = vector.broadcast %cst_97 : f32 to vector<14x20xf32>
    %214 = tpu.concatenate %212, %211, %213 in 0 : vector<1x20xf32>, vector<8x20xf32>, vector<14x20xf32> -> vector<23x20xf32>
    %215 = arith.addf %210, %214 : vector<23x20xf32>
    %216 = vector.extract_strided_slice %207 {offsets = [0, 40], sizes = [8, 20], strides = [1, 1]} : vector<8x320xf32> to vector<8x20xf32>
    %cst_98 = arith.constant 0.000000e+00 : f32
    %217 = vector.broadcast %cst_98 : f32 to vector<2x20xf32>
    %cst_99 = arith.constant 0.000000e+00 : f32
    %218 = vector.broadcast %cst_99 : f32 to vector<13x20xf32>
    %219 = tpu.concatenate %217, %216, %218 in 0 : vector<2x20xf32>, vector<8x20xf32>, vector<13x20xf32> -> vector<23x20xf32>
    %220 = arith.addf %215, %219 : vector<23x20xf32>
    %221 = vector.extract_strided_slice %207 {offsets = [0, 60], sizes = [8, 20], strides = [1, 1]} : vector<8x320xf32> to vector<8x20xf32>
    %cst_100 = arith.constant 0.000000e+00 : f32
    %222 = vector.broadcast %cst_100 : f32 to vector<3x20xf32>
    %cst_101 = arith.constant 0.000000e+00 : f32
    %223 = vector.broadcast %cst_101 : f32 to vector<12x20xf32>
    %224 = tpu.concatenate %222, %221, %223 in 0 : vector<3x20xf32>, vector<8x20xf32>, vector<12x20xf32> -> vector<23x20xf32>
    %225 = arith.addf %220, %224 : vector<23x20xf32>
    %226 = vector.extract_strided_slice %207 {offsets = [0, 80], sizes = [8, 20], strides = [1, 1]} : vector<8x320xf32> to vector<8x20xf32>
    %cst_102 = arith.constant 0.000000e+00 : f32
    %227 = vector.broadcast %cst_102 : f32 to vector<4x20xf32>
    %cst_103 = arith.constant 0.000000e+00 : f32
    %228 = vector.broadcast %cst_103 : f32 to vector<11x20xf32>
    %229 = tpu.concatenate %227, %226, %228 in 0 : vector<4x20xf32>, vector<8x20xf32>, vector<11x20xf32> -> vector<23x20xf32>
    %230 = arith.addf %225, %229 : vector<23x20xf32>
    %231 = vector.extract_strided_slice %207 {offsets = [0, 100], sizes = [8, 20], strides = [1, 1]} : vector<8x320xf32> to vector<8x20xf32>
    %cst_104 = arith.constant 0.000000e+00 : f32
    %232 = vector.broadcast %cst_104 : f32 to vector<5x20xf32>
    %cst_105 = arith.constant 0.000000e+00 : f32
    %233 = vector.broadcast %cst_105 : f32 to vector<10x20xf32>
    %234 = tpu.concatenate %232, %231, %233 in 0 : vector<5x20xf32>, vector<8x20xf32>, vector<10x20xf32> -> vector<23x20xf32>
    %235 = arith.addf %230, %234 : vector<23x20xf32>
    %236 = vector.extract_strided_slice %207 {offsets = [0, 120], sizes = [8, 20], strides = [1, 1]} : vector<8x320xf32> to vector<8x20xf32>
    %cst_106 = arith.constant 0.000000e+00 : f32
    %237 = vector.broadcast %cst_106 : f32 to vector<6x20xf32>
    %cst_107 = arith.constant 0.000000e+00 : f32
    %238 = vector.broadcast %cst_107 : f32 to vector<9x20xf32>
    %239 = tpu.concatenate %237, %236, %238 in 0 : vector<6x20xf32>, vector<8x20xf32>, vector<9x20xf32> -> vector<23x20xf32>
    %240 = arith.addf %235, %239 : vector<23x20xf32>
    %241 = vector.extract_strided_slice %207 {offsets = [0, 140], sizes = [8, 20], strides = [1, 1]} : vector<8x320xf32> to vector<8x20xf32>
    %cst_108 = arith.constant 0.000000e+00 : f32
    %242 = vector.broadcast %cst_108 : f32 to vector<7x20xf32>
    %cst_109 = arith.constant 0.000000e+00 : f32
    %243 = vector.broadcast %cst_109 : f32 to vector<8x20xf32>
    %244 = tpu.concatenate %242, %241, %243 in 0 : vector<7x20xf32>, vector<8x20xf32>, vector<8x20xf32> -> vector<23x20xf32>
    %245 = arith.addf %240, %244 : vector<23x20xf32>
    %246 = vector.extract_strided_slice %207 {offsets = [0, 160], sizes = [8, 20], strides = [1, 1]} : vector<8x320xf32> to vector<8x20xf32>
    %cst_110 = arith.constant 0.000000e+00 : f32
    %247 = vector.broadcast %cst_110 : f32 to vector<8x20xf32>
    %cst_111 = arith.constant 0.000000e+00 : f32
    %248 = vector.broadcast %cst_111 : f32 to vector<7x20xf32>
    %249 = tpu.concatenate %247, %246, %248 in 0 : vector<8x20xf32>, vector<8x20xf32>, vector<7x20xf32> -> vector<23x20xf32>
    %250 = arith.addf %245, %249 : vector<23x20xf32>
    %251 = vector.extract_strided_slice %207 {offsets = [0, 180], sizes = [8, 20], strides = [1, 1]} : vector<8x320xf32> to vector<8x20xf32>
    %cst_112 = arith.constant 0.000000e+00 : f32
    %252 = vector.broadcast %cst_112 : f32 to vector<9x20xf32>
    %cst_113 = arith.constant 0.000000e+00 : f32
    %253 = vector.broadcast %cst_113 : f32 to vector<6x20xf32>
    %254 = tpu.concatenate %252, %251, %253 in 0 : vector<9x20xf32>, vector<8x20xf32>, vector<6x20xf32> -> vector<23x20xf32>
    %255 = arith.addf %250, %254 : vector<23x20xf32>
    %256 = vector.extract_strided_slice %207 {offsets = [0, 200], sizes = [8, 20], strides = [1, 1]} : vector<8x320xf32> to vector<8x20xf32>
    %cst_114 = arith.constant 0.000000e+00 : f32
    %257 = vector.broadcast %cst_114 : f32 to vector<10x20xf32>
    %cst_115 = arith.constant 0.000000e+00 : f32
    %258 = vector.broadcast %cst_115 : f32 to vector<5x20xf32>
    %259 = tpu.concatenate %257, %256, %258 in 0 : vector<10x20xf32>, vector<8x20xf32>, vector<5x20xf32> -> vector<23x20xf32>
    %260 = arith.addf %255, %259 : vector<23x20xf32>
    %261 = vector.extract_strided_slice %207 {offsets = [0, 220], sizes = [8, 20], strides = [1, 1]} : vector<8x320xf32> to vector<8x20xf32>
    %cst_116 = arith.constant 0.000000e+00 : f32
    %262 = vector.broadcast %cst_116 : f32 to vector<11x20xf32>
    %cst_117 = arith.constant 0.000000e+00 : f32
    %263 = vector.broadcast %cst_117 : f32 to vector<4x20xf32>
    %264 = tpu.concatenate %262, %261, %263 in 0 : vector<11x20xf32>, vector<8x20xf32>, vector<4x20xf32> -> vector<23x20xf32>
    %265 = arith.addf %260, %264 : vector<23x20xf32>
    %266 = vector.extract_strided_slice %207 {offsets = [0, 240], sizes = [8, 20], strides = [1, 1]} : vector<8x320xf32> to vector<8x20xf32>
    %cst_118 = arith.constant 0.000000e+00 : f32
    %267 = vector.broadcast %cst_118 : f32 to vector<12x20xf32>
    %cst_119 = arith.constant 0.000000e+00 : f32
    %268 = vector.broadcast %cst_119 : f32 to vector<3x20xf32>
    %269 = tpu.concatenate %267, %266, %268 in 0 : vector<12x20xf32>, vector<8x20xf32>, vector<3x20xf32> -> vector<23x20xf32>
    %270 = arith.addf %265, %269 : vector<23x20xf32>
    %271 = vector.extract_strided_slice %207 {offsets = [0, 260], sizes = [8, 20], strides = [1, 1]} : vector<8x320xf32> to vector<8x20xf32>
    %cst_120 = arith.constant 0.000000e+00 : f32
    %272 = vector.broadcast %cst_120 : f32 to vector<13x20xf32>
    %cst_121 = arith.constant 0.000000e+00 : f32
    %273 = vector.broadcast %cst_121 : f32 to vector<2x20xf32>
    %274 = tpu.concatenate %272, %271, %273 in 0 : vector<13x20xf32>, vector<8x20xf32>, vector<2x20xf32> -> vector<23x20xf32>
    %275 = arith.addf %270, %274 : vector<23x20xf32>
    %276 = vector.extract_strided_slice %207 {offsets = [0, 280], sizes = [8, 20], strides = [1, 1]} : vector<8x320xf32> to vector<8x20xf32>
    %cst_122 = arith.constant 0.000000e+00 : f32
    %277 = vector.broadcast %cst_122 : f32 to vector<14x20xf32>
    %cst_123 = arith.constant 0.000000e+00 : f32
    %278 = vector.broadcast %cst_123 : f32 to vector<1x20xf32>
    %279 = tpu.concatenate %277, %276, %278 in 0 : vector<14x20xf32>, vector<8x20xf32>, vector<1x20xf32> -> vector<23x20xf32>
    %280 = arith.addf %275, %279 : vector<23x20xf32>
    %281 = vector.extract_strided_slice %207 {offsets = [0, 300], sizes = [8, 20], strides = [1, 1]} : vector<8x320xf32> to vector<8x20xf32>
    %cst_124 = arith.constant 0.000000e+00 : f32
    %282 = vector.broadcast %cst_124 : f32 to vector<15x20xf32>
    %283 = tpu.concatenate %282, %281 in 0 : vector<15x20xf32>, vector<8x20xf32> -> vector<23x20xf32>
    %284 = arith.addf %280, %283 : vector<23x20xf32>
    %285 = vector.broadcast %122 : vector<1x1xf32> to vector<23x20xf32>
    %286 = arith.addf %284, %285 : vector<23x20xf32>
    %c1_125 = arith.constant 1 : index
    %c0_126 = arith.constant 0 : index
    %c0_127 = arith.constant 0 : index
    %287 = vector.load %arg11[%c1_125, %c0_126, %c0_127] : memref<2x23x20xf32, #tpu.memory_space<vmem>>, vector<1x23x20xf32>
    %288 = vector.shape_cast %287 : vector<1x23x20xf32> to vector<23x20xf32>
    %289 = vector.shape_cast %286 : vector<23x20xf32> to vector<1x23x20xf32>
    tpu.vector_store %arg11[%c1_125, %c0_126, %c0_127], %289 {strides = array<i32>} : memref<2x23x20xf32, #tpu.memory_space<vmem>>, vector<1x23x20xf32>,
    return
  }
}

</mosaic_0001>

<bundles_post_ra>
// kernel: tpu_custom_call.1
= control target key start
LH: loop header
LB: loop body
LE: loop exit
PB: predicated region body
PF: predicated region fallthrough
CT: control target
= control target key end

     0   :  { %s1907_s23 = smov 88   ;;  %s1908_s24 = smov 8   ;;  %vm215_vm0 = vcmask 1040384   ;;  %vm229_vm1 = vcmask 155648   ;;  %vm227_vm2 = vcmask 162816   ;;  %vm518_vm3 = vcmask 1041408   ;;  %s2894_s3 = inlined_call_operand.vmem [shape: bf16[256,40], index: 3, kind: input, shape index: {}]   ;;  %s2895_s4 = inlined_call_operand.vmem [shape: bf16[256,160], index: 4, kind: input, shape index: {}]   ;;  %s2896_s5 = inlined_call_operand.vmem [shape: bf16[256,320], index: 5, kind: input, shape index: {}]   ;;  %s2897_s0 = inlined_call_operand.vmem [shape: bf16[16,256], index: 0, kind: input, shape index: {}]   ;;  %s2898_s1 = inlined_call_operand.vmem [shape: bf16[16,256], index: 1, kind: input, shape index: {}]   ;;  %s2899_s2 = inlined_call_operand.vmem [shape: bf16[16,256], index: 2, kind: input, shape index: {}]   ;;  %s2900_s6 = inlined_call_operand.<no memory space> [shape: f32[1,1], index: 6, kind: input, shape index: {}]   ;;  %s2901_s7 = inlined_call_operand.<no memory space> [shape: f32[1,1], index: 7, kind: input, shape index: {}]   ;;  %s2902_s8 = inlined_call_operand.<no memory space> [shape: f32[1,1], index: 8, kind: input, shape index: {}]   ;;  %s2903_s9 = inlined_call_operand.vmem [shape: f32[2,9,20], index: 9, kind: output, shape index: {0}]   ;;  %s2904_s10 = inlined_call_operand.vmem [shape: f32[2,15,20], index: 10, kind: output, shape index: {1}]   ;;  %s2905_s11 = inlined_call_operand.vmem [shape: f32[2,23,20], index: 11, kind: output, shape index: {2}]  }
   0x1   :  { %v1791_v0 = vld [vmem:[%s2894_s3 + $0x38] sm:$0xff]  ;;  %v1507_v2 = vld [vmem:[%s2895_s4 + $0x70] sm:$0xf]  ;;  %v1499_v10 = vld [vmem:[%s2895_s4 + $0x60] sm:$0xf]  ;;  %s1909_s25 = smov 68  }
   0x2   :  { %v1799_v1 = vld [vmem:[%s2894_s3 + $0x78] sm:$0xff]  ;;  %v1571_v4 = vld [vmem:[%s2895_s4 + $0xf0] sm:$0xf]  ;;  %182 = vmatpush.bf16.msra.mxu0 %v1791_v0  ;;  %v1815_v11 = vld [vmem:[%s2895_s4 + $0x64] sm:$0xf0]  ;;  %s1910_s26 = smov 48  }
   0x3   :  { %v1817_v3 = vld [vmem:[%s2895_s4 + $0x74] sm:$0xf0]  ;;  %196 = vmatpush.bf16.msra.mxu1 %v1799_v1  ;;  %v1790_v8 = vld [vmem:[%s2894_s3 + $0x30] sm:$0xff]  ;;  %v1563_v12 = vld [vmem:[%s2895_s4 + $0xe0] sm:$0xf]  ;;  %v1500_v14 = vor.u32 %v1815_v11, %v1499_v10  ;;  %s1911_s27 = smov 28  }
   0x4   :  { %v1833_v5 = vld [vmem:[%s2895_s4 + $0xf4] sm:$0xf0]  ;;  %v1508_v6 = vor.u32 %v1817_v3, %v1507_v2  ;;  %v1798_v9 = vld [vmem:[%s2894_s3 + $0x70] sm:$0xff]  ;;  %v1831_v13 = vld [vmem:[%s2895_s4 + $0xe4] sm:$0xf0]  ;;  %s1912_s28 = smov 116  }
   0x5   :  { %v1572_v7 = vor.u32 %v1833_v5, %v1571_v4  ;;  %v1564_v15 = vor.u32 %v1831_v13, %v1563_v12  ;;  %v1491_v16 = vld [vmem:[%s2895_s4 + $0x50] sm:$0xf]  ;;  %v1813_v17 = vld [vmem:[%s2895_s4 + $0x54] sm:$0xf0]  ;;  %v1789_v20 = vld [vmem:[%s2894_s3 + $0x28] sm:$0xff]  ;;  %s1914_s29 = smov 96  }
   0x6   :  { %449 = vmatpush.bf16.msra.mxu2 %v1508_v6  ;;  %v1555_v18 = vld [vmem:[%s2895_s4 + $0xd0] sm:$0xf]  ;;  %v1829_v19 = vld [vmem:[%s2895_s4 + $0xd4] sm:$0xf0]  ;;  %183 = vmatpush.bf16.msra.mxu0 %v1790_v8  ;;  %v1797_v21 = vld [vmem:[%s2894_s3 + $0x68] sm:$0xff]  ;;  %v1492_v22 = vor.u32 %v1813_v17, %v1491_v16  ;;  %s1917_s30 = smov 36  }
   0x7   :  { %463 = vmatpush.bf16.msra.mxu3 %v1572_v7  ;;  %197 = vmatpush.bf16.msra.mxu1 %v1798_v9  ;;  %v1556_v23 = vor.u32 %v1829_v19, %v1555_v18  ;;  %v1483_v24 = vld [vmem:[%s2895_s4 + $0x40] sm:$0xf]  ;;  %v1811_v25 = vld [vmem:[%s2895_s4 + $0x44] sm:$0xf0]  ;;  %v1475_v32 = vld [vmem:[%s2895_s4 + $0x30] sm:$0xf] }
   0x8   :  { %v1547_v26 = vld [vmem:[%s2895_s4 + $0xc0] sm:$0xf]  ;;  %v1827_v27 = vld [vmem:[%s2895_s4 + $0xc4] sm:$0xf0]  ;;  %v1484_v30 = vor.u32 %v1811_v25, %v1483_v24  ;;  %v1809_v33 = vld [vmem:[%s2895_s4 + $0x34] sm:$0xf0] }
   0x9   :  { %v1788_v28 = vld [vmem:[%s2894_s3 + $0x20] sm:$0xff]  ;;  %v1548_v31 = vor.u32 %v1827_v27, %v1547_v26  ;;  %v1539_v34 = vld [vmem:[%s2895_s4 + $0xb0] sm:$0xf]  ;;  %v1825_v35 = vld [vmem:[%s2895_s4 + $0xb4] sm:$0xf0]  ;;  %v1476_v38 = vor.u32 %v1809_v33, %v1475_v32  ;;  %s1918_s12 = smov 56  }
   0xa   :  { %450 = vmatpush.bf16.msra.mxu2 %v1500_v14  ;;  %184 = vmatpush.bf16.msra.mxu0 %v1789_v20  ;;  %v1796_v29 = vld [vmem:[%s2894_s3 + $0x60] sm:$0xff]  ;;  %v1787_v36 = vld [vmem:[%s2894_s3 + $0x18] sm:$0xff]  ;;  %v1540_v39 = vor.u32 %v1825_v35, %v1539_v34  ;;  %v1807_v41 = vld [vmem:[%s2895_s4 + $0x24] sm:$0xf0]  ;;  %s1919_s14 = smov 124   ;;  %vm527_vm4 = vcmask 1042432  }
   0xb   :  { %464 = vmatpush.bf16.msra.mxu3 %v1564_v15  ;;  %198 = vmatpush.bf16.msra.mxu1 %v1797_v21  ;;  %v1795_v37 = vld [vmem:[%s2894_s3 + $0x58] sm:$0xff]  ;;  %v1467_v40 = vld [vmem:[%s2895_s4 + $0x20] sm:$0xf]  ;;  %v1823_v43 = vld [vmem:[%s2895_s4 + $0xa4] sm:$0xf0]  ;;  %vm536_vm5 = vcmask 1043456  }
   0xc   :  { %v1531_v42 = vld [vmem:[%s2895_s4 + $0xa0] sm:$0xf]  ;;  %v1786_v44 = vld [vmem:[%s2894_s3 + $0x10] sm:$0xff]  ;;  %v1468_v46 = vor.u32 %v1807_v41, %v1467_v40  ;;  %v1805_v49 = vld [vmem:[%s2895_s4 + $0x14] sm:$0xf0]  ;;  %vm545_vm6 = vcmask 1044480  }
   0xd   :  { %v1794_v45 = vld [vmem:[%s2894_s3 + $0x50] sm:$0xff]  ;;  %v1532_v47 = vor.u32 %v1823_v43, %v1531_v42  ;;  %v1821_v51 = vld [vmem:[%s2895_s4 + $0x94] sm:$0xf0]  ;;  %v1785_v52 = vld [vmem:[%s2894_s3 + $0x8] sm:$0xff]  ;;  %vm557_vm7 = vcmask 64512   ;;  %vm560_vm8 = vcmask 1045504  }
   0xe   :  { %451 = vmatpush.bf16.msra.mxu2 %v1492_v22  ;;  %185 = vmatpush.bf16.msra.mxu0 %v1788_v28  ;;  %v1459_v48 = vld [vmem:[%s2895_s4 + $0x10] sm:$0xf]  ;;  %v1793_v53 = vld [vmem:[%s2894_s3 + $0x48] sm:$0xff]  ;;  %v1451_v54 = vld [vmem:[%s2895_s4] sm:$0xf]  ;;  %vm569_vm9 = vcmask 1046528  }
   0xf   :  { %465 = vmatpush.bf16.msra.mxu3 %v1556_v23  ;;  %199 = vmatpush.bf16.msra.mxu1 %v1796_v29  ;;  %v1523_v50 = vld [vmem:[%s2895_s4 + $0x90] sm:$0xf]  ;;  %v1803_v55 = vld [vmem:[%s2895_s4 + $0x4] sm:$0xf0]  ;;  %v1515_v56 = vld [vmem:[%s2895_s4 + $0x80] sm:$0xf]  ;;  %v1460_v59 = vor.u32 %v1805_v49, %v1459_v48 }
  0x10   :  { %v1819_v57 = vld [vmem:[%s2895_s4 + $0x84] sm:$0xf0]  ;;  %v1816_v58 = vld [vmem:[%s2895_s4 + $0x74] sm:$0xf]  ;;  %v1524_v60 = vor.u32 %v1821_v51, %v1523_v50  ;;  %v1784_v61 = vld [vmem:[%s2894_s3] sm:$0xff]  ;;  %v1452_v15 = vor.u32 %v1803_v55, %v1451_v54  ;;  %vm582_vm10 = vcmask 161792  }
  0x11   :  { %v1792_v62 = vld [vmem:[%s2894_s3 + $0x40] sm:$0xff]  ;;  %v1673_v63 = vld [vmem:[%s2896_s5 + $0xa8] sm:$0xf]  ;;  %v1858_v0 = vld [vmem:[%s2896_s5 + $0xb0] sm:$0xf0]  ;;  %v1516_v16 = vor.u32 %v1819_v57, %v1515_v56  ;;  %s1916_s3 = smov 104  }
  0x12   :  { %452 = vmatpush.bf16.msra.mxu2 %v1484_v30  ;;  %186 = vmatpush.bf16.msra.mxu0 %v1787_v36  ;;  %v1509_v1 = vld [vmem:[%s2895_s4 + $0x78] sm:$0xf0]  ;;  %v1832_v2 = vld [vmem:[%s2895_s4 + $0xf4] sm:$0xf]  ;;  %v1769_v4 = vld [vmem:[%s2896_s5 + $0x168] sm:$0xf]  ;;  %v1674_v20 = vor.u32 %v1858_v0, %v1673_v63 }
  0x13   :  { %466 = vmatpush.bf16.msra.mxu3 %v1548_v31  ;;  %200 = vmatpush.bf16.msra.mxu1 %v1795_v37  ;;  %v1573_v3 = vld [vmem:[%s2895_s4 + $0xf8] sm:$0xf0]  ;;  %v1882_v5 = vld [vmem:[%s2896_s5 + $0x170] sm:$0xf0]  ;;  %v1369_v6 = vld [vmem:[%s2897_s0] sm:$0xf]  ;;  %v1512_v13 = vor.u32 %v1816_v58, %v1509_v1 }
  0x14   :  { %v1783_v7 = vld [vmem:[%s2897_s0 + $0x4] sm:$0xf0]  ;;  %v1782_v8 = vld [vmem:[%s2897_s0 + $0x4] sm:$0xf]  ;;  %v1371_v9 = vld [vmem:[%s2897_s0 + $0x8] sm:$0xf0]  ;;  %v1576_v14 = vor.u32 %v1832_v2, %v1573_v3  ;;  %v1770_v21 = vor.u32 %v1882_v5, %v1769_v4 }
  0x15   :  { %v1443_v10 = vld [vmem:[%s2898_s1] sm:$0xf]  ;;  %v1801_v11 = vld [vmem:[%s2898_s1 + $0x4] sm:$0xf0]  ;;  %v1800_v12 = vld [vmem:[%s2898_s1 + $0x4] sm:$0xf]  ;;  %v1370_v25 = vor.u32 %v1783_v7, %v1369_v6  ;;  %v1374_v26 = vor.u32 %v1782_v8, %v1371_v9 }
  0x16   :  { %453 = vmatpush.bf16.msra.mxu2 %v1476_v38  ;;  %187 = vmatpush.bf16.msra.mxu0 %v1786_v44  ;;  %v1445_v17 = vld [vmem:[%s2898_s1 + $0x8] sm:$0xf0]  ;;  %v1661_v18 = vld [vmem:[%s2896_s5 + $0x90] sm:$0xf]  ;;  %v1814_v19 = vld [vmem:[%s2895_s4 + $0x64] sm:$0xf]  ;;  %v2197_v30 = vor.u32 %v1801_v11, %v1443_v10 }
  0x17   :  { %467 = vmatpush.bf16.msra.mxu3 %v1540_v39  ;;  %201 = vmatpush.bf16.msra.mxu1 %v1794_v45  ;;  %v1501_v22 = vld [vmem:[%s2895_s4 + $0x68] sm:$0xf0]  ;;  %v1830_v23 = vld [vmem:[%s2895_s4 + $0xe4] sm:$0xf]  ;;  %v1855_v27 = vld [vmem:[%s2896_s5 + $0x98] sm:$0xf0]  ;;  %v2199_v31 = vor.u32 %v1800_v12, %v1445_v17 }
  0x18   :  { %v1565_v24 = vld [vmem:[%s2895_s4 + $0xe8] sm:$0xf0]  ;;  %v1757_v28 = vld [vmem:[%s2896_s5 + $0x150] sm:$0xf]  ;;  %v1879_v29 = vld [vmem:[%s2896_s5 + $0x158] sm:$0xf0]  ;;  %v1504_v33 = vor.u32 %v1814_v19, %v1501_v22  ;;  %v1662_v36 = vor.u32 %v1855_v27, %v1661_v18 }
  0x19   :  { %v1649_v32 = vld [vmem:[%s2896_s5 + $0x78] sm:$0xf]  ;;  %v1568_v34 = vor.u32 %v1830_v23, %v1565_v24  ;;  %v1812_v35 = vld [vmem:[%s2895_s4 + $0x54] sm:$0xf]  ;;  %v1758_v37 = vor.u32 %v1879_v29, %v1757_v28  ;;  %v1493_v38 = vld [vmem:[%s2895_s4 + $0x58] sm:$0xf0] }
  0x1a   :  { %454 = vmatpush.bf16.msra.mxu2 %v1468_v46  ;;  %188 = vmatpush.bf16.msra.mxu0 %v1785_v52  ;;  %v1828_v39 = vld [vmem:[%s2895_s4 + $0xd4] sm:$0xf]  ;;  %v1557_v40 = vld [vmem:[%s2895_s4 + $0xd8] sm:$0xf0]  ;;  %v1852_v41 = vld [vmem:[%s2896_s5 + $0x80] sm:$0xf0]  ;;  %v1496_v45 = vor.u32 %v1812_v35, %v1493_v38 }
  0x1b   :  { %468 = vmatpush.bf16.msra.mxu3 %v1532_v47  ;;  %202 = vmatpush.bf16.msra.mxu1 %v1793_v53  ;;  %v1745_v42 = vld [vmem:[%s2896_s5 + $0x138] sm:$0xf]  ;;  %v1876_v43 = vld [vmem:[%s2896_s5 + $0x140] sm:$0xf0]  ;;  %v1637_v44 = vld [vmem:[%s2896_s5 + $0x60] sm:$0xf]  ;;  %v1560_v46 = vor.u32 %v1828_v39, %v1557_v40  ;;  %v1650_v48 = vor.u32 %v1852_v41, %v1649_v32 }
  0x1c   :  { %v1810_v47 = vld [vmem:[%s2895_s4 + $0x44] sm:$0xf]  ;;  %v1746_v49 = vor.u32 %v1876_v43, %v1745_v42  ;;  %v1485_v50 = vld [vmem:[%s2895_s4 + $0x48] sm:$0xf0]  ;;  %v1733_v54 = vld [vmem:[%s2896_s5 + $0x120] sm:$0xf] }
  0x1d   :  { %v1826_v51 = vld [vmem:[%s2895_s4 + $0xc4] sm:$0xf]  ;;  %v1549_v52 = vld [vmem:[%s2895_s4 + $0xc8] sm:$0xf0]  ;;  %v1625_v56 = vld [vmem:[%s2896_s5 + $0x48] sm:$0xf]  ;;  %v1488_v57 = vor.u32 %v1810_v47, %v1485_v50 }
  0x1e   :  { %455 = vmatpush.bf16.msra.mxu2 %v1460_v59  ;;  %189 = vmatpush.bf16.msra.mxu0 %v1784_v61  ;;  %v1849_v53 = vld [vmem:[%s2896_s5 + $0x68] sm:$0xf0]  ;;  %v1552_v58 = vor.u32 %v1826_v51, %v1549_v52  ;;  %v1808_v59 = vld [vmem:[%s2895_s4 + $0x34] sm:$0xf]  ;;  %v1541_v0 = vld [vmem:[%s2895_s4 + $0xb8] sm:$0xf0] }
  0x1f   :  { %469 = vmatpush.bf16.msra.mxu3 %v1524_v60  ;;  %203 = vmatpush.bf16.msra.mxu1 %v1792_v62  ;;  %v1873_v55 = vld [vmem:[%s2896_s5 + $0x128] sm:$0xf0]  ;;  %v1638_v60 = vor.u32 %v1849_v53, %v1637_v44  ;;  %v1477_v62 = vld [vmem:[%s2895_s4 + $0x38] sm:$0xf0]  ;;  %v1824_v63 = vld [vmem:[%s2895_s4 + $0xb4] sm:$0xf] }
  0x20   :  { %v1734_v61 = vor.u32 %v1873_v55, %v1733_v54  ;;  %v1846_v1 = vld [vmem:[%s2896_s5 + $0x50] sm:$0xf0]  ;;  %v1721_v2 = vld [vmem:[%s2896_s5 + $0x108] sm:$0xf]  ;;  %v1613_v4 = vld [vmem:[%s2896_s5 + $0x30] sm:$0xf]  ;;  %v1480_v5 = vor.u32 %v1808_v59, %v1477_v62  ;;  %v1544_v6 = vor.u32 %v1824_v63, %v1541_v0 }
  0x21   :  { %190 = vmatmul.bf16.vlgmr.msra.gmra.mxu0 %v1370_v25  ;;  %v1870_v3 = vld [vmem:[%s2896_s5 + $0x110] sm:$0xf0]  ;;  %v1806_v7 = vld [vmem:[%s2895_s4 + $0x24] sm:$0xf]  ;;  %v1626_v8 = vor.u32 %v1846_v1, %v1625_v56  ;;  %v1469_v10 = vld [vmem:[%s2895_s4 + $0x28] sm:$0xf0] }
  0x22   :  { %477 = vmatpush.bf16.msrb.mxu0 %v1512_v13  ;;  %456 = vmatpush.bf16.msra.mxu2 %v1452_v15  ;;  %v1722_v9 = vor.u32 %v1870_v3, %v1721_v2  ;;  %v1822_v11 = vld [vmem:[%s2895_s4 + $0xa4] sm:$0xf]  ;;  %v1533_v12 = vld [vmem:[%s2895_s4 + $0xa8] sm:$0xf0]  ;;  %v1843_v13 = vld [vmem:[%s2896_s5 + $0x38] sm:$0xf0]  ;;  %v1472_v17 = vor.u32 %v1806_v7, %v1469_v10 }
  0x23   :  { %491 = vmatpush.bf16.msrb.mxu1 %v1576_v14  ;;  %470 = vmatpush.bf16.msra.mxu3 %v1516_v16  ;;  %v1709_v14 = vld [vmem:[%s2896_s5 + $0xf0] sm:$0xf]  ;;  %v1867_v15 = vld [vmem:[%s2896_s5 + $0xf8] sm:$0xf0]  ;;  %v1601_v16 = vld [vmem:[%s2896_s5 + $0x18] sm:$0xf]  ;;  %v1536_v18 = vor.u32 %v1822_v11, %v1533_v12 }
  0x24   :  { %204 = vmatmul.bf16.vlgmr.msra.gmra.mxu1 %v1374_v26  ;;  %v1804_v19 = vld [vmem:[%s2895_s4 + $0x14] sm:$0xf]  ;;  %v1461_v22 = vld [vmem:[%s2895_s4 + $0x18] sm:$0xf0]  ;;  %v1840_v25 = vld [vmem:[%s2896_s5 + $0x20] sm:$0xf0] }
  0x25   :  { %457 = vmatmul.bf16.vlgmr.msra.gmra.mxu2 %v2197_v30  ;;  %v1820_v23 = vld [vmem:[%s2895_s4 + $0x94] sm:$0xf]  ;;  %v1525_v24 = vld [vmem:[%s2895_s4 + $0x98] sm:$0xf0]  ;;  %v1697_v26 = vld [vmem:[%s2896_s5 + $0xd8] sm:$0xf]  ;;  %v1464_v32 = vor.u32 %v1804_v19, %v1461_v22  ;;  %v1602_v35 = vor.u32 %v1840_v25, %v1601_v16  ;;  %v19_v25 = vstv %s2901_s7 }
  0x26   :  { %983 = vmatpush.bf16.msrb.mxu2 %v1674_v20  ;;  %471 = vmatmul.bf16.vlgmr.msra.gmra.mxu3 %v2199_v31  ;;  %v1614_v20 = vor.u32 %v1843_v13, %v1613_v4  ;;  %v1864_v27 = vld [vmem:[%s2896_s5 + $0xe0] sm:$0xf0]  ;;  %v1589_v28 = vld [vmem:[%s2896_s5] sm:$0xf]  ;;  %v1837_v29 = vld [vmem:[%s2896_s5 + $0x8] sm:$0xf0] }
  0x27   :  { %997 = vmatpush.bf16.msrb.mxu3 %v1770_v21  ;;  %478 = vmatpush.bf16.msrb.mxu0 %v1504_v33  ;;  %v1710_v21 = vor.u32 %v1867_v15, %v1709_v14  ;;  %v1528_v33 = vor.u32 %v1820_v23, %v1525_v24  ;;  %v1818_v38 = vld [vmem:[%s2895_s4 + $0x84] sm:$0xf]  ;;  %v1517_v39 = vld [vmem:[%s2895_s4 + $0x88] sm:$0xf0]  ;;  %v1685_v40 = vld [vmem:[%s2896_s5 + $0xc0] sm:$0xf]  ;;  %v1590_v51 = vor.u32 %v1837_v29, %v1589_v28 }
  0x28   :  { %492 = vmatpush.bf16.msrb.mxu1 %v1568_v34  ;;  %v1802_v34 = vld [vmem:[%s2895_s4 + $0x4] sm:$0xf]  ;;  %v1861_v41 = vld [vmem:[%s2896_s5 + $0xc8] sm:$0xf0]  ;;  %v1675_v43 = vld [vmem:[%s2896_s5 + $0xb4] sm:$0xf0]  ;;  %v1520_v50 = vor.u32 %v1818_v38, %v1517_v39 }
  0x29   :  { %v1857_v42 = vld [vmem:[%s2896_s5 + $0xac] sm:$0xf]  ;;  %v1835_v47 = vld [vmem:[%s2899_s2 + $0x4] sm:$0xf0]  ;;  %v1686_v52 = vor.u32 %v1861_v41, %v1685_v40  ;;  %v1854_v54 = vld [vmem:[%s2896_s5 + $0x94] sm:$0xf] }
  0x2a   :  { %984 = vmatpush.bf16.msrb.mxu2 %v1662_v36  ;;  %v1698_v36 = vor.u32 %v1864_v27, %v1697_v26  ;;  %v1881_v44 = vld [vmem:[%s2896_s5 + $0x16c] sm:$0xf]  ;;  %v1681_v55 = vld [vmem:[%s2896_s5 + $0xb0] sm:$0xf]  ;;  %v1678_v56 = vor.u32 %v1857_v42, %v1675_v43  ;;  %v1878_v62 = vld [vmem:[%s2896_s5 + $0x154] sm:$0xf] }
  0x2b   :  { %998 = vmatpush.bf16.msrb.mxu3 %v1758_v37  ;;  %479 = vmatpush.bf16.msrb.mxu0 %v1496_v45  ;;  %v1453_v37 = vld [vmem:[%s2895_s4 + $0x8] sm:$0xf0]  ;;  %v1771_v45 = vld [vmem:[%s2896_s5 + $0x174] sm:$0xf0]  ;;  %v1777_v59 = vld [vmem:[%s2896_s5 + $0x170] sm:$0xf] }
  0x2c   :  { %493 = vmatpush.bf16.msrb.mxu1 %v1560_v46  ;;  %v1581_v46 = vld [vmem:[%s2899_s2] sm:$0xf]  ;;  %v1583_v53 = vld [vmem:[%s2899_s2 + $0x8] sm:$0xf0]  ;;  %v1851_v2 = vld [vmem:[%s2896_s5 + $0x7c] sm:$0xf] }
  0x2d   :  { %v1759_v63 = vld [vmem:[%s2896_s5 + $0x15c] sm:$0xf0]  ;;  %v2395_v0 = vor.u32 %v1835_v47, %v1581_v46  ;;  %v1880_v10 = vld [vmem:[%s2896_s5 + $0x160] sm:$0xf0]  ;;  %v1651_v11 = vld [vmem:[%s2896_s5 + $0x84] sm:$0xf0] }
  0x2e   :  { %985 = vmatpush.bf16.msrb.mxu2 %v1650_v48  ;;  %v1834_v48 = vld [vmem:[%s2899_s2 + $0x4] sm:$0xf]  ;;  %v1762_v7 = vor.u32 %v1878_v62, %v1759_v63  ;;  %v1875_v12 = vld [vmem:[%s2896_s5 + $0x13c] sm:$0xf]  ;;  %v1747_v13 = vld [vmem:[%s2896_s5 + $0x144] sm:$0xf0]  ;;  %v1654_v16 = vor.u32 %v1851_v2, %v1651_v11 }
  0x2f   :  { %999 = vmatpush.bf16.msrb.mxu3 %v1746_v49  ;;  %480 = vmatpush.bf16.msrb.mxu0 %v1488_v57  ;;  %v1456_v49 = vor.u32 %v1802_v34, %v1453_v37  ;;  %v1774_v57 = vor.u32 %v1881_v44, %v1771_v45  ;;  %v2397_v1 = vor.u32 %v1834_v48, %v1583_v53  ;;  %v1657_v15 = vld [vmem:[%s2896_s5 + $0x80] sm:$0xf]  ;;  %v1639_v22 = vld [vmem:[%s2896_s5 + $0x6c] sm:$0xf0]  ;;  %v1872_v23 = vld [vmem:[%s2896_s5 + $0x124] sm:$0xf] }
  0x30   :  { %494 = vmatpush.bf16.msrb.mxu1 %v1552_v58  ;;  %v1859_v58 = vld [vmem:[%s2896_s5 + $0xb8] sm:$0xf0]  ;;  %v1753_v19 = vld [vmem:[%s2896_s5 + $0x140] sm:$0xf]  ;;  %v1735_v24 = vld [vmem:[%s2896_s5 + $0x12c] sm:$0xf0] }
  0x31   :  { %v1682_v3 = vor.u32 %v1859_v58, %v1681_v55  ;;  %v1645_v26 = vld [vmem:[%s2896_s5 + $0x68] sm:$0xf]  ;;  %v1845_v27 = vld [vmem:[%s2896_s5 + $0x4c] sm:$0xf]  ;;  %v1738_v34 = vor.u32 %v1872_v23, %v1735_v24  ;;  %20 = vst [vmem:[#allocation3] sm:$0x1] %v19_v25 }
  0x32   :  { %986 = vmatpush.bf16.msrb.mxu2 %v1638_v60  ;;  %v1883_v60 = vld [vmem:[%s2896_s5 + $0x178] sm:$0xf0]  ;;  %v1627_v37 = vld [vmem:[%s2896_s5 + $0x54] sm:$0xf0]  ;;  %v1869_v38 = vld [vmem:[%s2896_s5 + $0x10c] sm:$0xf] }
  0x33   :  { %1000 = vmatpush.bf16.msrb.mxu3 %v1734_v61  ;;  %481 = vmatpush.bf16.msrb.mxu0 %v1480_v5  ;;  %v1663_v61 = vld [vmem:[%s2896_s5 + $0x9c] sm:$0xf0]  ;;  %v1778_v4 = vor.u32 %v1883_v60, %v1777_v59  ;;  %v1669_v5 = vld [vmem:[%s2896_s5 + $0x98] sm:$0xf]  ;;  %v1905_v40 = vmov 0   ;;  %v1630_v45 = vor.u32 %v1845_v27, %v1627_v37  ;;  %s1913_s0 = smov 76  }
  0x34   :  { %495 = vmatpush.bf16.msrb.mxu1 %v1544_v6  ;;  %v1666_v6 = vor.u32 %v1854_v54, %v1663_v61  ;;  %v1723_v39 = vld [vmem:[%s2896_s5 + $0x114] sm:$0xf0]  ;;  %1900 = vset.pattern.permute.xlu0 %v1905_v40  ;;  %v1842_v41 = vld [vmem:[%s2896_s5 + $0x34] sm:$0xf]  ;;  %v1633_v44 = vld [vmem:[%s2896_s5 + $0x50] sm:$0xf] }
  0x35   :  { %1901 = vset.pattern.permute.xlu1 %v1905_v40  ;;  %v1726_v46 = vor.u32 %v1869_v38, %v1723_v39  ;;  %v1847_v47 = vld [vmem:[%s2896_s5 + $0x58] sm:$0xf0]  ;;  %v1729_v48 = vld [vmem:[%s2896_s5 + $0x110] sm:$0xf]  ;;  %v1844_v60 = vld [vmem:[%s2896_s5 + $0x40] sm:$0xf0] }
  0x36   :  { %987 = vmatpush.bf16.msrb.mxu2 %v1626_v8  ;;  %v1856_v8 = vld [vmem:[%s2896_s5 + $0xa0] sm:$0xf0]  ;;  %v1839_v54 = vld [vmem:[%s2896_s5 + $0x1c] sm:$0xf]  ;;  %v1634_v55 = vor.u32 %v1847_v47, %v1633_v44  ;;  %v1717_v61 = vld [vmem:[%s2896_s5 + $0xf8] sm:$0xf] }
  0x37   :  { %1001 = vmatpush.bf16.msrb.mxu3 %v1722_v9  ;;  %482 = vmatpush.bf16.msrb.mxu0 %v1472_v17  ;;  %v1765_v9 = vld [vmem:[%s2896_s5 + $0x158] sm:$0xf]  ;;  %v1750_v17 = vor.u32 %v1875_v12, %v1747_v13  ;;  %v1868_v62 = vld [vmem:[%s2896_s5 + $0x100] sm:$0xf0]  ;;  %v1603_v63 = vld [vmem:[%s2896_s5 + $0x24] sm:$0xf0] }
  0x38   :  { %496 = vmatpush.bf16.msrb.mxu1 %v1536_v18  ;;  %v1766_v14 = vor.u32 %v1880_v10, %v1765_v9  ;;  %v1853_v18 = vld [vmem:[%s2896_s5 + $0x88] sm:$0xf0]  ;;  %v1863_v2 = vld [vmem:[%s2896_s5 + $0xdc] sm:$0xf]  ;;  %v1606_v9 = vor.u32 %v1839_v54, %v1603_v63  ;;  %v1705_v12 = vld [vmem:[%s2896_s5 + $0xe0] sm:$0xf] }
  0x39   :  { %v1658_v28 = vor.u32 %v1853_v18, %v1657_v15  ;;  %v1841_v11 = vld [vmem:[%s2896_s5 + $0x28] sm:$0xf0]  ;;  %s1920_s4 = smov 84   ;;  %vm1168_vm11 = vcmask 130048  }
  0x3a   :  { %988 = vmatpush.bf16.msrb.mxu2 %v1614_v20  ;;  %v1877_v20 = vld [vmem:[%s2896_s5 + $0x148] sm:$0xf0] }
  0x3b   :  { %1002 = vmatpush.bf16.msrb.mxu3 %v1710_v21  ;;  %483 = vmatpush.bf16.msrb.mxu0 %v1464_v32  ;;  %v17_v21 = vstv %s2900_s6  ;;  %v1754_v29 = vor.u32 %v1877_v20, %v1753_v19  ;;  %v1850_v32 = vld [vmem:[%s2896_s5 + $0x70] sm:$0xf0]  ;;  %v1865_v13 = vld [vmem:[%s2896_s5 + $0xe8] sm:$0xf0]  ;;  %v1597_v19 = vld [vmem:[%s2896_s5 + $0x8] sm:$0xf] }
  0x3c   :  { %497 = vmatpush.bf16.msrb.mxu1 %v1528_v33  ;;  %18 = vst [vmem:[#allocation2] sm:$0x1] %v17_v21  ;;  %v1646_v42 = vor.u32 %v1850_v32, %v1645_v26  ;;  %v1838_v20 = vld [vmem:[%s2896_s5 + $0x10] sm:$0xf0]  ;;  %v1693_v21 = vld [vmem:[%s2896_s5 + $0xc8] sm:$0xf] }
  0x3d   :  { %v1598_v23 = vor.u32 %v1838_v20, %v1597_v19  ;;  %s1915_s6 = smov 16  }
  0x3e   :  { %989 = vmatpush.bf16.msrb.mxu2 %v1602_v35  ;;  %v1741_v35 = vld [vmem:[%s2896_s5 + $0x128] sm:$0xf] }
  0x3f   :  { %1003 = vmatpush.bf16.msrb.mxu3 %v1698_v36  ;;  %484 = vmatpush.bf16.msrb.mxu0 %v1456_v49  ;;  %v1874_v36 = vld [vmem:[%s2896_s5 + $0x130] sm:$0xf0]  ;;  %v1871_v49 = vld [vmem:[%s2896_s5 + $0x118] sm:$0xf0] }
  0x40   :  { %498 = vmatpush.bf16.msrb.mxu1 %v1520_v50  ;;  %v1742_v43 = vor.u32 %v1874_v36, %v1741_v35  ;;  %v1615_v50 = vld [vmem:[%s2896_s5 + $0x3c] sm:$0xf0] }
  0x41   :  { %v1618_v58 = vor.u32 %v1842_v41, %v1615_v50 }
  0x42   :  { %990 = vmatpush.bf16.msrb.mxu2 %v1590_v51  ;;  %485 = vmatmul.bf16.vlgmr.msrb.gmra.mxu0 %v2197_v30  ;;  %v1848_v30 = vld [vmem:[%s2896_s5 + $0x64] sm:$0xf]  ;;  %v1866_v51 = vld [vmem:[%s2896_s5 + $0xf4] sm:$0xf] }
  0x43   :  { %1004 = vmatpush.bf16.msrb.mxu3 %v1686_v52  ;;  %1011 = vmatpush.bf16.msra.mxu0 %v1678_v56  ;;  %v1642_v33 = vor.u32 %v1848_v30, %v1639_v22  ;;  %v1711_v52 = vld [vmem:[%s2896_s5 + $0xfc] sm:$0xf0]  ;;  %v1730_v56 = vor.u32 %v1871_v49, %v1729_v48  ;;  %v1860_v30 = vld [vmem:[%s2896_s5 + $0xc4] sm:$0xf]  ;;  %v1862_v22 = vld [vmem:[%s2896_s5 + $0xd0] sm:$0xf0] }
  0x44   :  { %1025 = vmatpush.bf16.msra.mxu1 %v1774_v57  ;;  %v1902_v53 = vld [vmem:[#allocation2] ss:$0 sm:$0xff]  ;;  %v1621_v57 = vld [vmem:[%s2896_s5 + $0x38] sm:$0xf]  ;;  %v1714_v59 = vor.u32 %v1866_v51, %v1711_v52  ;;  %v1694_v24 = vor.u32 %v1862_v22, %v1693_v21 }
  0x45   :  { %499 = vmatmul.bf16.vlgmr.msrb.gmra.mxu1 %v2199_v31  ;;  %991 = vmatmul.bf16.vlgmr.msrb.gmra.mxu2 %v2395_v0  ;;  %v1670_v31 = vor.u32 %v1856_v8, %v1669_v5  ;;  %v1591_v5 = vld [vmem:[%s2896_s5 + $0xc] sm:$0xf0]  ;;  %v1609_v8 = vld [vmem:[%s2896_s5 + $0x20] sm:$0xf] }
  0x46   :  { %1005 = vmatmul.bf16.vlgmr.msrb.gmra.mxu3 %v2397_v1  ;;  %1039 = vmatpush.bf16.msra.mxu2 %v1682_v3  ;;  %v1699_v3 = vld [vmem:[%s2896_s5 + $0xe4] sm:$0xf0]  ;;  %v1610_v15 = vor.u32 %v1841_v11, %v1609_v8 }
  0x47   :  { %1053 = vmatpush.bf16.msra.mxu3 %v1778_v4  ;;  %1012 = vmatpush.bf16.msra.mxu0 %v1666_v6  ;;  %v1836_v4 = vld [vmem:[%s2896_s5 + $0x4] sm:$0xf]  ;;  %v1622_v6 = vor.u32 %v1844_v60, %v1621_v57  ;;  %v1702_v10 = vor.u32 %v1863_v2, %v1699_v3 }
  0x48   :  { %1026 = vmatpush.bf16.msra.mxu1 %v1762_v7  ;;  %222 = vperm.xlu0 %1900, %v1902_v53   ;;  %v1718_v7 = vor.u32 %v1868_v62, %v1717_v61 }
  0x4a   :  { %1040 = vmatpush.bf16.msra.mxu2 %v1670_v31  ;;  %v1687_v31 = vld [vmem:[%s2896_s5 + $0xcc] sm:$0xf0]  ;;  %s1906_s5 = smov 108  }
  0x4b   :  { %1054 = vmatpush.bf16.msra.mxu3 %v1766_v14  ;;  %1013 = vmatpush.bf16.msra.mxu0 %v1654_v16  ;;  %v1903_v14 = vld [vmem:[#allocation3] ss:$0 sm:$0xff]  ;;  %v1706_v16 = vor.u32 %v1865_v13, %v1705_v12  ;;  %v1690_v18 = vor.u32 %v1860_v30, %v1687_v31 }
  0x4c   :  { %1027 = vmatpush.bf16.msra.mxu1 %v1750_v17  ;;  %v1594_v17 = vor.u32 %v1836_v4, %v1591_v5 }
  0x4e   :  { %1041 = vmatpush.bf16.msra.mxu2 %v1658_v28 }
  0x4f   :  { %1055 = vmatpush.bf16.msra.mxu3 %v1754_v29  ;;  %1014 = vmatpush.bf16.msra.mxu0 %v1642_v33 }
  0x50   :  { %1028 = vmatpush.bf16.msra.mxu1 %v1738_v34  ;;  %576 = vperm.xlu0 %1900, %v1903_v14  }
  0x52   :  { %1042 = vmatpush.bf16.msra.mxu2 %v1646_v42 }
  0x53   :  { %1056 = vmatpush.bf16.msra.mxu3 %v1742_v43  ;;  %1015 = vmatpush.bf16.msra.mxu0 %v1630_v45 }
  0x54   :  { %1029 = vmatpush.bf16.msra.mxu1 %v1726_v46 }
  0x56   :  { %1043 = vmatpush.bf16.msra.mxu2 %v1634_v55 }
  0x57   :  { %1057 = vmatpush.bf16.msra.mxu3 %v1730_v56  ;;  %1016 = vmatpush.bf16.msra.mxu0 %v1618_v58 }
  0x58   :  { %1030 = vmatpush.bf16.msra.mxu1 %v1714_v59 }
  0x5a   :  { %1044 = vmatpush.bf16.msra.mxu2 %v1622_v6 }
  0x5b   :  { %1058 = vmatpush.bf16.msra.mxu3 %v1718_v7  ;;  %1017 = vmatpush.bf16.msra.mxu0 %v1606_v9 }
  0x5c   :  { %1031 = vmatpush.bf16.msra.mxu1 %v1702_v10 }
  0x5e   :  { %1045 = vmatpush.bf16.msra.mxu2 %v1610_v15 }
  0x5f   :  { %1059 = vmatpush.bf16.msra.mxu3 %v1706_v16  ;;  %1018 = vmatpush.bf16.msra.mxu0 %v1594_v17 }
  0x60   :  { %1032 = vmatpush.bf16.msra.mxu1 %v1690_v18 }
  0x62   :  { %1019 = vmatmul.bf16.vlgmr.msra.gmra.mxu0 %v2395_v0  ;;  %1046 = vmatpush.bf16.msra.mxu2 %v1598_v23 }
  0x63   :  { %1033 = vmatmul.bf16.vlgmr.msra.gmra.mxu1 %v2397_v1  ;;  %1060 = vmatpush.bf16.msra.mxu3 %v1694_v24 }
  0x65   :  { %1047 = vmatmul.bf16.vlgmr.msra.gmra.mxu2 %v2395_v0 }
  0x66   :  { %1061 = vmatmul.bf16.vlgmr.msra.gmra.mxu3 %v2397_v1 }
  0x9e   :  { %v191_v25 = vpop.f32.mrf.mxu0 }
  0xa1   :  { %v205_v26 = vpop.f32.mrf.mxu1 }
  0xa2   :  { %v2569_v27 = vadd.f32 %v205_v26, %v191_v25 }
  0xa4   :  { %v211_v28 = vrot.slane %v2569_v27, 7 }
  0xa6   :  { %212 = vrot.lane.b32.xlu0 %v211_v28, %s1906_s5  ;;  %v193_v41 = vpop.f32.mrf.mxu0 }
  0xa8   :  { %v458_v29 = vpop.f32.mrf.mxu2 }
  0xa9   :  { %v472_v32 = vpop.f32.mrf.mxu3  ;;  %v207_v42 = vpop.f32.mrf.mxu1 }
  0xaa   :  { %v2573_v33 = vadd.f32 %v472_v32, %v458_v29  ;;  %v2589_v43 = vadd.f32 %v207_v42, %v193_v41 }
  0xac   :  { %v514_v34 = vrot.slane %v2573_v33, 6  ;;  %v506_v35 = vrot.slane %v2573_v33, 7  ;;  %v551_v0 = vrot.slane %v2573_v33, 2  ;;  %v523_v38 = vrot.slane %v2573_v33, 5 }
  0xad   :  { %v532_v39 = vrot.slane %v2573_v33, 4  ;;  %v232_v44 = vrot.slane %v2589_v43, 7  ;;  %v541_v45 = vrot.slane %v2573_v33, 3 }
  0xae   :  { %515 = vrot.lane.b32.xlu2 %v514_v34, %s1907_s23  ;;  %507 = vrot.lane.b32.xlu1 %v506_v35, %s1906_s5 }
  0xaf   :  { %553 = vrot.lane.b32.xlu0 %v551_v0, %s1908_s24 }
  0xb0   :  { %v460_v1 = vpop.f32.mrf.mxu2 }
  0xb1   :  { %v474_v36 = vpop.f32.mrf.mxu3 }
  0xb2   :  { %v2581_v37 = vadd.f32 %v474_v36, %v460_v1 }
  0xb4   :  { %v601_v40 = vrot.slane %v2581_v37, 5  ;;  %v626_v46 = vrot.slane %v2581_v37, 2  ;;  %v593_v47 = vrot.slane %v2581_v37, 6  ;;  %v585_v48 = vrot.slane %v2581_v37, 7 }
  0xb5   :  { %v617_v53 = vrot.slane %v2581_v37, 3  ;;  %v609_v54 = vrot.slane %v2581_v37, 4 }
  0xb6   :  { %524 = vrot.lane.b32.xlu2 %v523_v38, %s1909_s25  ;;  %533 = vrot.lane.b32.xlu1 %v532_v39, %s1910_s26 }
  0xb7   :  { %602 = vrot.lane.b32.xlu0 %v601_v40, %s1909_s25 }
  0xba   :  { %v2644_v29 = vpop.permute.xlu0 %222 }
  0xbe   :  { %542 = vrot.lane.b32.xlu2 %v541_v45, %s1911_s27  ;;  %233 = vrot.lane.b32.xlu1 %v232_v44, %s1906_s5  ;;  %v21_v45 = vstv %s2902_s8 }
  0xbf   :  { %628 = vrot.lane.b32.xlu0 %v626_v46, %s1908_s24  ;;  %v486_v55 = vpop.f32.mrf.mxu0  ;;  %22 = vst [vmem:[#allocation4] sm:$0x1] %v21_v45 }
  0xc2   :  { %v500_v56 = vpop.f32.mrf.mxu1  ;;  %v2653_v1 = vpop.permute.xlu0 %576 }
  0xc3   :  { %v501_v57 = vadd.f32 %v500_v56, %v486_v55 }
  0xc5   :  { %v552_v61 = vrot.slane %v501_v57, 2  ;;  %v565_v62 = vrot.slane %v501_v57, 1 }
  0xc6   :  { %594 = vrot.lane.b32.xlu2 %v593_v47, %s1907_s23  ;;  %586 = vrot.lane.b32.xlu1 %v585_v48, %s1906_s5 }
  0xc7   :  { %v488_v3 = vpop.f32.mrf.mxu0 }
  0xc8   :  { %v992_v49 = vpop.f32.mrf.mxu2 }
  0xc9   :  { %v1006_v50 = vpop.f32.mrf.mxu3 }
  0xca   :  { %v2601_v51 = vadd.f32 %v1006_v50, %v992_v49  ;;  %v502_v4 = vpop.f32.mrf.mxu1 }
  0xcb   :  { %v503_v30 = vadd.f32 %v502_v4, %v488_v3 }
  0xcc   :  { %v1068_v52 = vrot.slane %v2601_v51, 7  ;;  %v1092_v58 = vrot.slane %v2601_v51, 4  ;;  %v1084_v5 = vrot.slane %v2601_v51, 5  ;;  %v1076_v6 = vrot.slane %v2601_v51, 6 }
  0xcd   :  { %v1109_v11 = vrot.slane %v2601_v51, 2  ;;  %v1100_v12 = vrot.slane %v2601_v51, 3  ;;  %v627_v31 = vrot.slane %v503_v30, 2  ;;  %v638_v14 = vrot.slane %v503_v30, 1 }
  0xce   :  { %1069 = vrot.lane.b32.xlu0 %v1068_v52, %s1906_s5  ;;  %618 = vrot.lane.b32.xlu2 %v617_v53, %s1911_s27 }
  0xcf   :  { %610 = vrot.lane.b32.xlu1 %v609_v54, %s1910_s26 }
  0xd0   :  { %v994_v59 = vpop.f32.mrf.mxu2 }
  0xd1   :  { %v1008_v60 = vpop.f32.mrf.mxu3 }
  0xd2   :  { %v2611_v63 = vadd.f32 %v1008_v60, %v994_v59 }
  0xd4   :  { %v1231_v2 = vrot.slane %v2611_v63, 5  ;;  %v1256_v9 = vrot.slane %v2611_v63, 2  ;;  %v1215_v16 = vrot.slane %v2611_v63, 7  ;;  %v1223_v18 = vrot.slane %v2611_v63, 6 }
  0xd5   :  { %v1239_v19 = vrot.slane %v2611_v63, 4  ;;  %v1247_v26 = vrot.slane %v2611_v63, 3 }
  0xd6   :  { %1093 = vrot.lane.b32.xlu0 %v1092_v58, %s1910_s26  ;;  %566 = vrot.lane.b32.xlu2 %v565_v62, %s1912_s28 }
  0xd7   :  { %555 = vrot.lane.b32.xlu1 %v552_v61, %s1908_s24 }
  0xde   :  { %1232 = vrot.lane.b32.xlu0 %v1231_v2, %s1909_s25  ;;  %1085 = vrot.lane.b32.xlu2 %v1084_v5, %s1909_s25 }
  0xdf   :  { %1077 = vrot.lane.b32.xlu1 %v1076_v6, %s1907_s23  ;;  %v1020_v7 = vpop.f32.mrf.mxu0 }
  0xe0   :  { %v1034_v8 = vpop.f32.mrf.mxu1 }
  0xe1   :  { %v1035_v10 = vadd.f32 %v1034_v8, %v1020_v7 }
  0xe3   :  { %v1110_v13 = vrot.slane %v1035_v10, 2  ;;  %v1134_v15 = vrot.slane %v1035_v10, 7  ;;  %v1162_v17 = vrot.slane %v1035_v10, 4  ;;  %v1121_v28 = vrot.slane %v1035_v10, 1 }
  0xe4   :  { %v1152_v35 = vrot.slane %v1035_v10, 5  ;;  %v1143_v0 = vrot.slane %v1035_v10, 6 }
  0xe6   :  { %1258 = vrot.lane.b32.xlu0 %v1256_v9, %s1908_s24  ;;  %1111 = vrot.lane.b32.xlu2 %v1109_v11, %s1908_s24 }
  0xe7   :  { %1101 = vrot.lane.b32.xlu1 %v1100_v12, %s1911_s27  ;;  %v1022_v20 = vpop.f32.mrf.mxu0 }
  0xe8   :  { %v1036_v21 = vpop.f32.mrf.mxu1  ;;  %v1048_v22 = vpop.f32.mrf.mxu2 }
  0xe9   :  { %v1062_v23 = vpop.f32.mrf.mxu3  ;;  %v2638_v24 = vadd.f32 %v1036_v21, %v1022_v20 }
  0xea   :  { %v2641_v25 = vadd.f32 %v1062_v23, %v1048_v22 }
  0xeb   :  { %v1299_v38 = vrot.slane %v2638_v24, 5  ;;  %v1268_v42 = vrot.slane %v2638_v24, 1  ;;  %v1290_v53 = vrot.slane %v2638_v24, 6  ;;  %v1309_v59 = vrot.slane %v2638_v24, 4 }
  0xec   :  { %v1185_v32 = vrot.slane %v2641_v25, 2  ;;  %v1163_v41 = vrot.slane %v2641_v25, 4  ;;  %v1176_v54 = vrot.slane %v2641_v25, 3  ;;  %v1257_v60 = vrot.slane %v2638_v24, 2 }
  0xed   :  { %v1281_v4 = vrot.slane %v2638_v24, 7  ;;  %v1194_v11 = vrot.slane %v2641_v25, 1 }
  0xee   :  { %1113 = vrot.lane.b32.xlu0 %v1110_v13, %s1908_s24  ;;  %639 = vrot.lane.b32.xlu2 %v638_v14, %s1912_s28 }
  0xef   :  { %630 = vrot.lane.b32.xlu1 %v627_v31, %s1908_s24  ;;  %v1904_v31 = vld [vmem:[#allocation4] ss:$0 sm:$0xff] }
  0xf0   :  { %v1050_v39 = vpop.f32.mrf.mxu2 }
  0xf1   :  { %v1064_v40 = vpop.f32.mrf.mxu3 }
  0xf2   :  { %v1065_v44 = vadd.f32 %v1064_v40, %v1050_v39 }
  0xf4   :  { %v1310_v48 = vrot.slane %v1065_v44, 4  ;;  %v1340_v58 = vrot.slane %v1065_v44, 1  ;;  %v1322_v3 = vrot.slane %v1065_v44, 3  ;;  %v1331_v12 = vrot.slane %v1065_v44, 2 }
  0xf6   :  { %1135 = vrot.lane.b32.xlu0 %v1134_v15, %s1913_s0  ;;  %1129 = vrot.lane.b32.xlu2 %v1035_v10, %s1914_s29 }
  0xf7   :  { %1216 = vrot.lane.b32.xlu1 %v1215_v16, %s1906_s5 }
  0xfe   :  { %1164 = vrot.lane.b32.xlu0 %v1162_v17, %s1915_s6  ;;  %1224 = vrot.lane.b32.xlu2 %v1223_v18, %s1907_s23 }
  0xff   :  { %1240 = vrot.lane.b32.xlu1 %v1239_v19, %s1910_s26 }
 0x106   :  { %1276 = vrot.lane.b32.xlu0 %v2638_v24, %s1914_s29  ;;  %1248 = vrot.lane.b32.xlu2 %v1247_v26, %s1911_s27 }
 0x107   :  { %1122 = vrot.lane.b32.xlu1 %v1121_v28, %s1912_s28 }
 0x108   :  { %v2649_v34 = vpop.permute.xlu2 %515 }
 0x109   :  { %v519_v18 = vsel %vm518_vm3, 0.0, %v2649_v34  ;;  %v520_v19 = vsel %vm518_vm3, %v2649_v34, 0.0 }
 0x10e   :  { %1186 = vrot.lane.b32.xlu0 %v1185_v32, %s1916_s3  ;;  %1153 = vrot.lane.b32.xlu2 %v1152_v35, %s1917_s30 }
 0x10f   :  { %1144 = vrot.lane.b32.xlu1 %v1143_v0, %s1918_s12 }
 0x110   :  { %v2655_v36 = vpop.permute.xlu2 %524 }
 0x111   :  { %v529_v23 = vsel %vm527_vm4, %v2655_v36, 0.0 }
 0x116   :  { %1300 = vrot.lane.b32.xlu0 %v1299_v38, %s1917_s30  ;;  %1269 = vrot.lane.b32.xlu2 %v1268_v42, %s1912_s28 }
 0x117   :  { %1166 = vrot.lane.b32.xlu1 %v1163_v41, %s1915_s6 }
 0x118   :  { %v2665_v46 = vpop.permute.xlu2 %542  ;;  %v213_v47 = vpop.permute.xlu0 %212 }
 0x119   :  { %v216_v49 = vsel %vm215_vm0, 0.0, %v213_v47  ;;  %v226_v50 = vadd.f32 %v2644_v29, %v213_v47  ;;  %v546_v0 = vsel %vm545_vm6, 0.0, %v2665_v46 }
 0x11a   :  { %v217_v52 = vadd.f32 %v216_v49, %v2569_v27 }
 0x11b   :  { %230 = vst.msk [vmem:[%s2903_s9 + $0x8] sm:$0x1] %vm229_vm1, %v226_v50 }
 0x11c   :  { %v225_v55 = vadd.f32 %v2644_v29, %v217_v52 }
 0x11e   :  { %1313 = vrot.lane.b32.xlu0 %v1310_v48, %s1915_s6  ;;  %1291 = vrot.lane.b32.xlu2 %v1290_v53, %s1918_s12  ;;  %228 = vst.msk [vmem:[%s2903_s9] sm:$0xff] %vm227_vm2, %v225_v55 }
 0x11f   :  { %1177 = vrot.lane.b32.xlu1 %v1176_v54, %s1919_s14 }
 0x120   :  { %v2683_v27 = vpop.permute.xlu2 %594  ;;  %v508_v56 = vpop.permute.xlu1 %507 }
 0x121   :  { %v2685_v57 = vpop.permute.xlu0 %553  ;;  %v511_v15 = vsel %vm215_vm0, %v508_v56, 0.0 }
 0x122   :  { %v522_v21 = vadd.f32 %v520_v19, %v511_v15 }
 0x124   :  { %v531_v28 = vadd.f32 %v529_v23, %v522_v21 }
 0x126   :  { %1341 = vrot.lane.b32.xlu0 %v1340_v58, %s1920_s4  ;;  %1311 = vrot.lane.b32.xlu2 %v1309_v59, %s1915_s6 }
 0x127   :  { %1260 = vrot.lane.b32.xlu1 %v1257_v60, %s1908_s24 }
 0x128   :  { %v534_v61 = vpop.permute.xlu1 %533  ;;  %v2691_v62 = vpop.permute.xlu2 %618 }
 0x129   :  { %v2693_v2 = vpop.permute.xlu0 %602  ;;  %v537_v24 = vsel %vm536_vm5, 0.0, %v534_v61  ;;  %v538_v25 = vsel %vm536_vm5, %v534_v61, 0.0 }
 0x12a   :  { %v540_v32 = vadd.f32 %v538_v25, %v531_v28 }
 0x12e   :  { %1323 = vrot.lane.b32.xlu2 %v1322_v3, %s1919_s14 }
 0x12f   :  { %1282 = vrot.lane.b32.xlu1 %v1281_v4, %s1913_s0 }
 0x130   :  { %v234_v5 = vpop.permute.xlu1 %233  ;;  %v567_v9 = vpop.permute.xlu2 %566 }
 0x131   :  { %v236_v6 = vsel %vm215_vm0, 0.0, %v234_v5  ;;  %v240_v7 = vadd.f32 %v234_v5, %v2644_v29  ;;  %v2706_v13 = vpop.permute.xlu0 %628  ;;  %v570_v48 = vsel %vm569_vm9, 0.0, %v567_v9 }
 0x132   :  { %v237_v8 = vadd.f32 %v236_v6, %v2589_v43  ;;  %v510_v43 = vsel %vm215_vm0, 0.0, %v508_v56 }
 0x133   :  { %1440 = vst.msk [vmem:[%s2903_s9 + $0x18] sm:$0x1] %vm229_vm1, %v240_v7  ;;  %v512_v14 = vadd.f32 %v510_v43, %v2573_v33  ;;  %v528_v33 = vsel %vm527_vm4, 0.0, %v2655_v36  ;;  %v547_v36 = vsel %vm545_vm6, %v2665_v46, 0.0  ;;  %v598_v43 = vsel %vm518_vm3, %v2683_v27, 0.0 }
 0x134   :  { %v239_v10 = vadd.f32 %v237_v8, %v2644_v29  ;;  %v549_v40 = vadd.f32 %v547_v36, %v540_v32  ;;  %v621_v36 = vsel %vm545_vm6, 0.0, %v2691_v62 }
 0x135   :  { %v521_v20 = vadd.f32 %v519_v18, %v512_v14  ;;  %v606_v18 = vsel %vm527_vm4, %v2693_v2, 0.0 }
 0x136   :  { %1439 = vst.msk [vmem:[%s2903_s9 + $0x10] sm:$0xff] %vm227_vm2, %v239_v10  ;;  %1195 = vrot.lane.b32.xlu2 %v1194_v11, %s1920_s4 }
 0x137   :  { %1332 = vrot.lane.b32.xlu1 %v1331_v12, %s1916_s3  ;;  %v530_v26 = vadd.f32 %v528_v33, %v521_v20  ;;  %v597_v12 = vsel %vm518_vm3, 0.0, %v2683_v27 }
 0x138   :  { %v587_v30 = vpop.permute.xlu1 %586  ;;  %v1086_v16 = vpop.permute.xlu2 %1085 }
 0x139   :  { %v539_v29 = vadd.f32 %v537_v24, %v530_v26  ;;  %v589_v56 = vsel %vm215_vm0, 0.0, %v587_v30  ;;  %v1089_v5 = vsel %vm527_vm4, %v1086_v16, 0.0  ;;  %v590_v7 = vsel %vm215_vm0, %v587_v30, 0.0 }
 0x13a   :  { %v591_v6 = vadd.f32 %v589_v56, %v2581_v37  ;;  %v600_v15 = vadd.f32 %v598_v43, %v590_v7  ;;  %v605_v30 = vsel %vm527_vm4, 0.0, %v2693_v2 }
 0x13b   :  { %v548_v39 = vadd.f32 %v546_v0, %v539_v29 }
 0x13c   :  { %v599_v14 = vadd.f32 %v597_v12, %v591_v6  ;;  %v608_v25 = vadd.f32 %v606_v18, %v600_v15 }
 0x13e   :  { %v607_v24 = vadd.f32 %v605_v30, %v599_v14 }
 0x13f   :  { %1205 = vperm.xlu1 %1901, %v1904_v31  }
 0x140   :  { %v1070_v17 = vpop.permute.xlu0 %1069  ;;  %v2728_v35 = vpop.permute.xlu2 %1111 }
 0x141   :  { %v2720_v22 = vpop.permute.xlu1 %610  ;;  %v1072_v49 = vsel %vm215_vm0, 0.0, %v1070_v17  ;;  %v1073_v53 = vsel %vm215_vm0, %v1070_v17, 0.0 }
 0x142   :  { %v613_v27 = vsel %vm536_vm5, 0.0, %v2720_v22  ;;  %v614_v21 = vsel %vm536_vm5, %v2720_v22, 0.0  ;;  %v622_v22 = vsel %vm545_vm6, %v2691_v62, 0.0 }
 0x143   :  { %v615_v28 = vadd.f32 %v613_v27, %v607_v24  ;;  %v616_v29 = vadd.f32 %v614_v21, %v608_v25 }
 0x148   :  { %v1094_v34 = vpop.permute.xlu0 %1093  ;;  %v640_v59 = vpop.permute.xlu2 %639 }
 0x149   :  { %v556_v38 = vpop.permute.xlu1 %555  ;;  %v1096_v10 = vsel %vm536_vm5, 0.0, %v1094_v34 }
 0x14a   :  { %v558_v41 = vsel %vm557_vm7, %v2685_v57, %v556_v38  ;;  %v1074_v57 = vadd.f32 %v1072_v49, %v2601_v51  ;;  %v1088_v51 = vsel %vm527_vm4, 0.0, %v1086_v16  ;;  %v1097_v16 = vsel %vm536_vm5, %v1094_v34, 0.0 }
 0x14b   :  { %v561_v42 = vsel %vm560_vm8, 0.0, %v558_v41  ;;  %v562_v44 = vsel %vm560_vm8, %v558_v41, 0.0  ;;  %v623_v41 = vadd.f32 %v621_v36, %v615_v28  ;;  %v642_v49 = vsel %vm569_vm9, 0.0, %v640_v59 }
 0x14c   :  { %v563_v45 = vadd.f32 %v561_v42, %v548_v39  ;;  %v564_v47 = vadd.f32 %v562_v44, %v549_v40  ;;  %v624_v42 = vadd.f32 %v622_v22, %v616_v29 }
 0x14e   :  { %v571_v50 = vadd.f32 %v570_v48, %v563_v45  ;;  %v572_v52 = vadd.f32 %v567_v9, %v564_v47 }
 0x150   :  { %v2740_v46 = vpop.permute.xlu0 %1232  ;;  %v579_v54 = vadd.f32 %v2653_v1, %v571_v50  ;;  %v580_v55 = vadd.f32 %v2653_v1, %v572_v52  ;;  %v1130_v26 = vpop.permute.xlu2 %1129 }
 0x151   :  { %v1078_v58 = vpop.permute.xlu1 %1077 }
 0x152   :  { %581 = vst.msk [vmem:[%s2904_s10] sm:$0xff] %vm227_vm2, %v579_v54  ;;  %v1080_v60 = vsel %vm518_vm3, 0.0, %v1078_v58  ;;  %v1081_v61 = vsel %vm518_vm3, %v1078_v58, 0.0 }
 0x153   :  { %583 = vst.msk [vmem:[%s2904_s10 + $0x8] sm:$0x7f] %vm582_vm10, %v580_v55  ;;  %v1082_v3 = vadd.f32 %v1080_v60, %v1074_v57  ;;  %v1083_v4 = vadd.f32 %v1081_v61, %v1073_v53 }
 0x155   :  { %v1090_v8 = vadd.f32 %v1088_v51, %v1082_v3  ;;  %v1091_v9 = vadd.f32 %v1089_v5, %v1083_v4 }
 0x157   :  { %v1098_v31 = vadd.f32 %v1096_v10, %v1090_v8  ;;  %v1099_v17 = vadd.f32 %v1097_v16, %v1091_v9  ;;  %v1236_v10 = vsel %vm527_vm4, %v2740_v46, 0.0 }
 0x158   :  { %v2762_v11 = vpop.permute.xlu0 %1258  ;;  %v1225_v50 = vpop.permute.xlu2 %1224 }
 0x159   :  { %v1102_v37 = vpop.permute.xlu1 %1101  ;;  %v1228_v7 = vsel %vm518_vm3, %v1225_v50, 0.0 }
 0x15a   :  { %v1104_v19 = vsel %vm545_vm6, 0.0, %v1102_v37  ;;  %v1105_v20 = vsel %vm545_vm6, %v1102_v37, 0.0 }
 0x15b   :  { %v1106_v33 = vadd.f32 %v1104_v19, %v1098_v31  ;;  %v1107_v23 = vadd.f32 %v1105_v20, %v1099_v17  ;;  %v1227_v20 = vsel %vm518_vm3, 0.0, %v1225_v50 }
 0x160   :  { %v1114_v32 = vpop.permute.xlu0 %1113  ;;  %v2804_v56 = vpop.permute.xlu2 %1248 }
 0x161   :  { %v1115_v2 = vsel %vm557_vm7, %v2728_v35, %v1114_v32  ;;  %v631_v40 = vpop.permute.xlu1 %630  ;;  %v1252_v18 = vsel %vm545_vm6, %v2804_v56, 0.0 }
 0x162   :  { %v1117_v34 = vsel %vm560_vm8, 0.0, %v1115_v2  ;;  %v1118_v0 = vsel %vm560_vm8, %v1115_v2, 0.0  ;;  %v632_v44 = vsel %vm557_vm7, %v2706_v13, %v631_v40 }
 0x163   :  { %v2787_v38 = vadd.f32 %v1117_v34, %v1106_v33  ;;  %v1120_v39 = vadd.f32 %v1118_v0, %v1107_v23  ;;  %v634_v35 = vsel %vm560_vm8, 0.0, %v632_v44  ;;  %v635_v45 = vsel %vm560_vm8, %v632_v44, 0.0 }
 0x164   :  { %v636_v47 = vadd.f32 %v634_v35, %v623_v41  ;;  %v637_v48 = vadd.f32 %v635_v45, %v624_v42 }
 0x166   :  { %v643_v52 = vadd.f32 %v642_v49, %v636_v47  ;;  %v644_v62 = vadd.f32 %v640_v59, %v637_v48 }
 0x168   :  { %v645_v53 = vadd.f32 %v643_v52, %v2653_v1  ;;  %v646_v54 = vadd.f32 %v644_v62, %v2653_v1  ;;  %v1136_v13 = vpop.permute.xlu0 %1135  ;;  %v1154_v60 = vpop.permute.xlu2 %1153 }
 0x169   :  { %v1217_v55 = vpop.permute.xlu1 %1216  ;;  %v1138_v28 = vsel %vm215_vm0, 0.0, %v1136_v13  ;;  %v1139_v0 = vsel %vm215_vm0, %v1136_v13, 0.0  ;;  %v1156_v44 = vsel %vm527_vm4, 0.0, %v1154_v60  ;;  %v1157_v35 = vsel %vm527_vm4, %v1154_v60, 0.0 }
 0x16a   :  { %1577 = vst.msk [vmem:[%s2904_s10 + $0x10] sm:$0xff] %vm227_vm2, %v645_v53  ;;  %v1220_v5 = vsel %vm215_vm0, %v1217_v55, 0.0  ;;  %v1219_v31 = vsel %vm215_vm0, 0.0, %v1217_v55 }
 0x16b   :  { %1578 = vst.msk [vmem:[%s2904_s10 + $0x18] sm:$0x7f] %vm582_vm10, %v646_v54  ;;  %v1230_v8 = vadd.f32 %v1228_v7, %v1220_v5  ;;  %v1221_v17 = vadd.f32 %v1219_v31, %v2611_v63 }
 0x16d   :  { %v1238_v14 = vadd.f32 %v1236_v10, %v1230_v8  ;;  %v1229_v23 = vadd.f32 %v1227_v20, %v1221_v17 }
 0x170   :  { %v1165_v58 = vpop.permute.xlu0 %1164  ;;  %v2808_v3 = vpop.permute.xlu2 %1269 }
 0x171   :  { %v1241_v57 = vpop.permute.xlu1 %1240  ;;  %v1273_v63 = vsel %vm569_vm9, %v2808_v3, 0.0 }
 0x172   :  { %v1244_v12 = vsel %vm536_vm5, %v1241_v57, 0.0  ;;  %v1243_v2 = vsel %vm536_vm5, 0.0, %v1241_v57 }
 0x173   :  { %v1246_v15 = vadd.f32 %v1244_v12, %v1238_v14 }
 0x175   :  { %v1254_v27 = vadd.f32 %v1252_v18, %v1246_v15 }
 0x178   :  { %v1277_v61 = vpop.permute.xlu0 %1276  ;;  %v1292_v6 = vpop.permute.xlu2 %1291 }
 0x179   :  { %v2806_v59 = vpop.permute.xlu1 %1122  ;;  %v1294_v13 = vsel %vm518_vm3, 0.0, %v1292_v6 }
 0x17a   :  { %v1126_v43 = vsel %vm569_vm9, %v2806_v59, 0.0 }
 0x17b   :  { %v1128_v16 = vadd.f32 %v1126_v43, %v1120_v39 }
 0x17d   :  { %v1133_v21 = vadd.f32 %v1130_v26, %v1128_v16  ;;  %v1235_v26 = vsel %vm527_vm4, 0.0, %v2740_v46  ;;  %v1295_v46 = vsel %vm518_vm3, %v1292_v6, 0.0  ;;  %v1251_v16 = vsel %vm545_vm6, 0.0, %v2804_v56 }
 0x17e   :  { %v1237_v36 = vadd.f32 %v1235_v26, %v1229_v23 }
 0x180   :  { %v2810_v51 = vpop.permute.xlu0 %1186  ;;  %v1312_v30 = vpop.permute.xlu2 %1311  ;;  %v1245_v45 = vadd.f32 %v1243_v2, %v1237_v36  ;;  %v1272_v2 = vsel %vm569_vm9, 0.0, %v2808_v3 }
 0x181   :  { %v1145_v1 = vpop.permute.xlu1 %1144  ;;  %v1189_v20 = vsel %vm560_vm8, 0.0, %v2810_v51 }
 0x182   :  { %v1147_v29 = vsel %vm518_vm3, 0.0, %v1145_v1  ;;  %v1148_v32 = vsel %vm518_vm3, %v1145_v1, 0.0 }
 0x183   :  { %v1151_v40 = vadd.f32 %v1148_v32, %v1139_v0  ;;  %v1125_v32 = vsel %vm569_vm9, 0.0, %v2806_v59 }
 0x184   :  { %v1127_v0 = vadd.f32 %v1125_v32, %v2787_v38 }
 0x188   :  { %v1301_v37 = vpop.permute.xlu0 %1300  ;;  %v1324_v48 = vpop.permute.xlu2 %1323 }
 0x189   :  { %v1167_v4 = vpop.permute.xlu1 %1166  ;;  %v1304_v60 = vsel %vm527_vm4, %v1301_v37, 0.0  ;;  %v1303_v7 = vsel %vm527_vm4, 0.0, %v1301_v37  ;;  %v1326_v18 = vsel %vm545_vm6, 0.0, %v1324_v48  ;;  %v1327_v37 = vsel %vm545_vm6, %v1324_v48, 0.0 }
 0x18a   :  { %v1169_v22 = vsel %vm1168_vm11, %v1165_v58, %v1167_v4  ;;  %v1160_v58 = vadd.f32 %v1157_v35, %v1151_v40 }
 0x18b   :  { %v1171_v49 = vsel %vm536_vm5, 0.0, %v1169_v22  ;;  %v1172_v62 = vsel %vm536_vm5, %v1169_v22, 0.0 }
 0x18c   :  { %v1175_v10 = vadd.f32 %v1172_v62, %v1160_v58 }
 0x190   :  { %v1314_v41 = vpop.permute.xlu0 %1313 }
 0x191   :  { %v1178_v9 = vpop.permute.xlu1 %1177  ;;  %v1315_v53 = vsel %vm1168_vm11, %v1312_v30, %v1314_v41 }
 0x192   :  { %v1180_v1 = vsel %vm545_vm6, 0.0, %v1178_v9  ;;  %v1318_v12 = vsel %vm536_vm5, %v1315_v53, 0.0  ;;  %v1317_v6 = vsel %vm536_vm5, 0.0, %v1315_v53 }
 0x199   :  { %v1261_v19 = vpop.permute.xlu1 %1260 }
 0x19a   :  { %v1262_v33 = vsel %vm557_vm7, %v2762_v11, %v1261_v19  ;;  %v1141_v11 = vadd.f32 %v1138_v28, %v1133_v21  ;;  %v1342_v28 = vpop.permute.xlu0 %1341 }
 0x19b   :  { %v1265_v24 = vsel %vm560_vm8, %v1262_v33, 0.0  ;;  %v1264_v19 = vsel %vm560_vm8, 0.0, %v1262_v33 }
 0x19c   :  { %v1267_v25 = vadd.f32 %v1265_v24, %v1254_v27  ;;  %v1150_v39 = vadd.f32 %v1147_v29, %v1141_v11  ;;  %v1190_v27 = vsel %vm560_vm8, %v2810_v51, 0.0  ;;  %v1196_v24 = vpop.permute.xlu2 %1195  ;;  %v1344_v11 = vsel %vm569_vm9, 0.0, %v1342_v28 }
 0x19d   :  { %v1198_v51 = vsel %vm569_vm9, 0.0, %v1196_v24 }
 0x19e   :  { %v1275_v34 = vadd.f32 %v1273_v63, %v1267_v25  ;;  %v1159_v57 = vadd.f32 %v1156_v44, %v1150_v39 }
 0x1a0   :  { %v1280_v42 = vadd.f32 %v1277_v61, %v1275_v34  ;;  %v1181_v61 = vsel %vm545_vm6, %v1178_v9, 0.0  ;;  %v1174_v8 = vadd.f32 %v1171_v49, %v1159_v57  ;;  %v1253_v9 = vadd.f32 %v1251_v16, %v1245_v45 }
 0x1a1   :  { %v1283_v47 = vpop.permute.xlu1 %1282  ;;  %v1184_v15 = vadd.f32 %v1181_v61, %v1175_v10 }
 0x1a2   :  { %v1285_v50 = vsel %vm215_vm0, 0.0, %v1283_v47  ;;  %v1286_v52 = vsel %vm215_vm0, %v1283_v47, 0.0  ;;  %v1183_v14 = vadd.f32 %v1180_v1, %v1174_v8  ;;  %v1266_v33 = vadd.f32 %v1264_v19, %v1253_v9 }
 0x1a3   :  { %v1288_v54 = vadd.f32 %v1285_v50, %v1280_v42  ;;  %v1298_v55 = vadd.f32 %v1295_v46, %v1286_v52  ;;  %v1193_v56 = vadd.f32 %v1190_v27, %v1184_v15 }
 0x1a4   :  { %v1192_v25 = vadd.f32 %v1189_v20, %v1183_v14  ;;  %v1274_v40 = vadd.f32 %v1272_v2, %v1266_v33 }
 0x1a5   :  { %v1297_v4 = vadd.f32 %v1294_v13, %v1288_v54  ;;  %v1307_v5 = vadd.f32 %v1304_v60, %v1298_v55  ;;  %v1201_v22 = vadd.f32 %v1196_v24, %v1193_v56 }
 0x1a6   :  { %v1200_v36 = vadd.f32 %v1198_v51, %v1192_v25 }
 0x1a7   :  { %v1306_v43 = vadd.f32 %v1303_v7, %v1297_v4  ;;  %v1321_v31 = vadd.f32 %v1318_v12, %v1307_v5 }
 0x1a9   :  { %v1333_v17 = vpop.permute.xlu1 %1332  ;;  %v1320_v30 = vadd.f32 %v1317_v6, %v1306_v43  ;;  %v1330_v23 = vadd.f32 %v1327_v37, %v1321_v31 }
 0x1aa   :  { %v1335_v63 = vsel %vm560_vm8, 0.0, %v1333_v17  ;;  %v1336_v29 = vsel %vm560_vm8, %v1333_v17, 0.0 }
 0x1ab   :  { %v1329_v21 = vadd.f32 %v1326_v18, %v1320_v30  ;;  %v1339_v34 = vadd.f32 %v1336_v29, %v1330_v23 }
 0x1ad   :  { %v1338_v26 = vadd.f32 %v1335_v63, %v1329_v21  ;;  %v1347_v35 = vadd.f32 %v1342_v28, %v1339_v34 }
 0x1af   :  { %v1346_v39 = vadd.f32 %v1344_v11, %v1338_v26 }
 0x1b1   :  { %v1206_v41 = vpop.permute.xlu1 %1205 }
 0x1b2   :  { %v1208_v42 = vadd.f32 %v1206_v41, %v1127_v0  ;;  %v1209_v44 = vadd.f32 %v1206_v41, %v1200_v36  ;;  %v1210_v59 = vadd.f32 %v1206_v41, %v1201_v22  ;;  %v1348_v45 = vadd.f32 %v1274_v40, %v1206_v41 }
 0x1b3   :  { %v1349_v3 = vadd.f32 %v1346_v39, %v1206_v41  ;;  %v1350_v38 = vadd.f32 %v1347_v35, %v1206_v41 }
 0x1b4   :  { %1211 = vst.msk [vmem:[%s2905_s11] sm:$0xff] %vm227_vm2, %v1208_v42 }
 0x1b5   :  { %1212 = vst.msk [vmem:[%s2905_s11 + $0x8] sm:$0xff] %vm227_vm2, %v1209_v44 }
 0x1b6   :  { %1213 = vst.msk [vmem:[%s2905_s11 + $0x10] sm:$0x7f] %vm582_vm10, %v1210_v59 }
 0x1b7   :  { %1779 = vst.msk [vmem:[%s2905_s11 + $0x18] sm:$0xff] %vm227_vm2, %v1348_v45 }
 0x1b8   :  { %1780 = vst.msk [vmem:[%s2905_s11 + $0x20] sm:$0xff] %vm227_vm2, %v1349_v3 }
 0x1b9   :  { %1781 = vst.msk [vmem:[%s2905_s11 + $0x28] sm:$0x7f] %vm582_vm10, %v1350_v38 }

</bundles_post_ra>
